<compile_context>
chip_gen: v5e
topology: v5e:2x2
jax: 0.10.0
libtpu: 0.0.40
codegen_flags: <defaults>
</compile_context>

<pallas_src>
import jax
import jax.numpy as jnp
from jax.experimental import pallas as pl
from jax.experimental.pallas import tpu as pltpu


def cam_head_kernel(f_ref, w_ref, o_ref):
    # f_ref: (tile_b, C, tile_l)  f32 stage4 features; channels on sublanes,
    #                             flattened spatial (H*W) on lanes.
    # w_ref: (K, C)               f32 classifier 1x1-conv weight.
    # o_ref: (tile_b, K, tile_l)  f32 relu(w @ f), lane-dense along spatial.
    w = w_ref[...].astype(jnp.bfloat16)            # tiny; hidden under DMA
    for b in range(f_ref.shape[0]):                # tile_b in {1, 2}: static unroll
        logits = jnp.dot(w, f_ref[b].astype(jnp.bfloat16),
                         preferred_element_type=jnp.float32)   # f32 MXU accum
        o_ref[b] = jnp.maximum(logits, 0.0).astype(o_ref.dtype)


def _choose_tiling(L, max_tile_l):
    """Return (tile_l, padded_L) with tile_l lane-legal and tile_l | padded_L."""
    max_tile_l = max(int(max_tile_l), 128)
    if L <= max_tile_l:
        return L, L                      # single tile spanning the full axis
    # Largest 128-multiple divisor of L that fits the budget.
    t = (max_tile_l // 128) * 128
    while t >= 128:
        if L % t == 0:
            return t, L
        t -= 128
    # No divisor: fixed 128-multiple tile, pad L up to a multiple of it.
    t = (max_tile_l // 128) * 128
    padded = ((L + t - 1) // t) * t
    return t, padded


def _vmem_bytes_estimate(tile_b, C, tile_l, K):
    """Conservative double-buffered VMEM estimate (lane/sublane padded, f32)."""
    lane = lambda n: ((n + 127) // 128) * 128
    sub = lambda n: ((n + 7) // 8) * 8
    feat = tile_b * sub(C) * lane(tile_l) * 4
    out = tile_b * sub(K) * lane(tile_l) * 4
    w = sub(K) * lane(C) * 4
    return 2 * (feat + out + w)


def cam_head(feats_nchw, weight_kc11, *, max_tile_l=512):
    """feats_nchw: (2, C, H, W) f32 stage4 features; weight: (K, C, 1, 1) f32.

    Returns (K, H, W), matching `relu(conv1x1(x))[0] + relu(conv1x1(x))[1].flip(-1)`.
    """
    B, C, H, W = feats_nchw.shape
    assert B == 2, "CAM head expects a (image, flipped-image) pair"
    K = weight_kc11.shape[0]
    L = H * W

    # Free reshapes only (no HBM transpose / no dtype cast): NCHW -> (B, C, L).
    f = feats_nchw.reshape(B, C, L)
    w = weight_kc11.reshape(K, C)

    tile_l, padded_L = _choose_tiling(L, max_tile_l)
    if padded_L != L:
        # Rare fallback (odd multi-scale sizes): pad spatial axis so blocks
        # divide exactly and stores stay lane-dense; padded columns are zeros
        # and get sliced off below.
        f = jnp.pad(f, ((0, 0), (0, 0), (0, padded_L - L)))
    n_l = padded_L // tile_l

    # Tiny-map batch fusion: one grid step for both images when the whole
    # feature pair is small (per-step overhead would otherwise dominate on the
    # single-TC v5e/v6e; the parallelism loss on v7x at this size is < 1 us).
    fuse_batch = (n_l == 1) and (B * C * padded_L * 4 <= 2 * 1024 * 1024)
    tile_b = B if fuse_batch else 1
    n_b = B // tile_b

    # Raise the scoped VMEM limit only if the tiles actually need it; cap at
    # 48 MiB so we never exceed v7x's 64 MiB physical VMEM.
    vmem_need = _vmem_bytes_estimate(tile_b, C, tile_l, K) + (2 << 20)
    vmem_limit = None
    if vmem_need > 16 * 1024 * 1024:
        vmem_limit = min(vmem_need, 48 * 1024 * 1024)

    y = pl.pallas_call(
        cam_head_kernel,
        out_shape=jax.ShapeDtypeStruct((B, K, padded_L), jnp.float32),
        grid_spec=pltpu.PrefetchScalarGridSpec(
            num_scalar_prefetch=0,
            grid=(n_b, n_l),
            in_specs=[
                pl.BlockSpec((tile_b, C, tile_l), lambda b, i: (b, 0, i)),
                pl.BlockSpec((K, C), lambda b, i: (0, 0)),
            ],
            out_specs=pl.BlockSpec((tile_b, K, tile_l), lambda b, i: (b, 0, i)),
        ),
        compiler_params=pltpu.CompilerParams(
            dimension_semantics=("parallel", "parallel"),
            vmem_limit_bytes=vmem_limit),
    )(f, w)

    # y[b] == relu(conv1x1(feats[b])) laid out as (K, H*W) == PyTorch (K, H, W).
    # The flip+add epilogue runs on the tiny (K, H, W) logits (PyTorch op order:
    # conv -> relu -> flip result); it is O(K*H*W) and negligible vs. the
    # feature DMA, so it stays as a fused XLA epilogue in the wrapper.
    if padded_L != L:
        y = y[:, :, :L]
    y = y.reshape(B, K, H, W)
    return y[0] + y[1][:, :, ::-1]


if __name__ == "__main__":
    key = jax.random.PRNGKey(0)
    k_feat, k_w = jax.random.split(key)

    # Small-but-faithful shapes: stage4 of ResNet50 with strides (2,2,2,1) on a
    # 128x128 image pair -> (2, 2048, 8, 8); classifier is Conv2d(2048, 20, 1).
    B, C, H, W = 2, 2048, 8, 8
    n_classes = 20

    feats = jax.random.normal(k_feat, (B, C, H, W), dtype=jnp.float32)
    # nn.Conv2d(2048, n_classes, 1, bias=False) weight, deterministic init.
    weight = jax.random.normal(k_w, (n_classes, C, 1, 1), dtype=jnp.float32)
    weight = weight * (1.0 / jnp.sqrt(C))

    cam_head_jit = jax.jit(cam_head)
    out = jax.block_until_ready(cam_head_jit(feats, weight))

    # Pure-JAX f32 reference of the same head.
    logits = jnp.einsum("bchw,kc->bkhw", feats, weight.reshape(n_classes, C))
    relu = jnp.maximum(logits, 0.0)
    ref = relu[0] + relu[1][:, :, ::-1]

    assert out.shape == (n_classes, H, W), out.shape
    # In-kernel bf16 operands (f32 accumulation) -> slightly looser tolerance.
    assert jnp.allclose(out, ref, atol=5e-2, rtol=5e-2), \
        float(jnp.max(jnp.abs(out - ref)))
    print("KERNEL_OK")
</pallas_src>

<mosaic_0001>
module attributes {stable_mosaic.version = 11 : i64} {
  func.func @cam_head_kernel(%arg0: i32, %arg1: i32, %arg2: memref<2x2048x64xf32, #tpu.memory_space<vmem>>, %arg3: memref<20x2048xf32, #tpu.memory_space<vmem>>, %arg4: memref<2x20x64xf32, #tpu.memory_space<vmem>>) attributes {dimension_semantics = [#tpu.dimension_semantics<parallel>, #tpu.dimension_semantics<parallel>], iteration_bounds = array<i64: 1, 1>, scalar_prefetch = 0 : i64, scratch_operands = 0 : i64, tpu.core_type = #tpu.core_type<tc>, window_params = [{transform_indices = @transform_0, window_bounds = array<i64: 2, 2048, 64>}, {pipeline_mode = #tpu.pipeline_mode<synchronous>, transform_indices = @transform_1, window_bounds = array<i64: 20, 2048>}, {transform_indices = @transform_2, window_bounds = array<i64: 2, 20, 64>}]} {
    %c0 = arith.constant 0 : index
    %c0_0 = arith.constant 0 : index
    %0 = vector.load %arg3[%c0, %c0_0] : memref<20x2048xf32, #tpu.memory_space<vmem>>, vector<20x2048xf32>
    %1 = arith.truncf %0 : vector<20x2048xf32> to vector<20x2048xbf16>
    %c0_1 = arith.constant 0 : index
    %c0_2 = arith.constant 0 : index
    %c0_3 = arith.constant 0 : index
    %2 = vector.load %arg2[%c0_1, %c0_2, %c0_3] : memref<2x2048x64xf32, #tpu.memory_space<vmem>>, vector<1x2048x64xf32>
    %3 = vector.shape_cast %2 : vector<1x2048x64xf32> to vector<2048x64xf32>
    %4 = arith.truncf %3 : vector<2048x64xf32> to vector<2048x64xbf16>
    %cst = arith.constant dense<0.000000e+00> : vector<20x64xf32>
    %5 = tpu.matmul %1, %4, %cst {dimension_numbers = #tpu.dot_dimension_numbers<[1], [0], [0], [1], [0, 0, 1, 1], [], []>} : vector<20x2048xbf16>, vector<2048x64xbf16>, vector<20x64xf32> -> vector<20x64xf32>
    %cst_4 = arith.constant 0.000000e+00 : f32
    %6 = vector.broadcast %cst_4 : f32 to vector<20x64xf32>
    %7 = arith.maximumf %5, %6 : vector<20x64xf32>
    %c0_5 = arith.constant 0 : index
    %c0_6 = arith.constant 0 : index
    %c0_7 = arith.constant 0 : index
    %8 = vector.load %arg4[%c0_5, %c0_6, %c0_7] : memref<2x20x64xf32, #tpu.memory_space<vmem>>, vector<1x20x64xf32>
    %9 = vector.shape_cast %8 : vector<1x20x64xf32> to vector<20x64xf32>
    %10 = vector.shape_cast %7 : vector<20x64xf32> to vector<1x20x64xf32>
    tpu.vector_store %arg4[%c0_5, %c0_6, %c0_7], %10 {strides = array<i32>} : memref<2x20x64xf32, #tpu.memory_space<vmem>>, vector<1x20x64xf32>,
    %c1 = arith.constant 1 : index
    %c0_8 = arith.constant 0 : index
    %c0_9 = arith.constant 0 : index
    %11 = vector.load %arg2[%c1, %c0_8, %c0_9] : memref<2x2048x64xf32, #tpu.memory_space<vmem>>, vector<1x2048x64xf32>
    %12 = vector.shape_cast %11 : vector<1x2048x64xf32> to vector<2048x64xf32>
    %13 = arith.truncf %12 : vector<2048x64xf32> to vector<2048x64xbf16>
    %cst_10 = arith.constant dense<0.000000e+00> : vector<20x64xf32>
    %14 = tpu.matmul %1, %13, %cst_10 {dimension_numbers = #tpu.dot_dimension_numbers<[1], [0], [0], [1], [0, 0, 1, 1], [], []>} : vector<20x2048xbf16>, vector<2048x64xbf16>, vector<20x64xf32> -> vector<20x64xf32>
    %cst_11 = arith.constant 0.000000e+00 : f32
    %15 = vector.broadcast %cst_11 : f32 to vector<20x64xf32>
    %16 = arith.maximumf %14, %15 : vector<20x64xf32>
    %c1_12 = arith.constant 1 : index
    %c0_13 = arith.constant 0 : index
    %c0_14 = arith.constant 0 : index
    %17 = vector.load %arg4[%c1_12, %c0_13, %c0_14] : memref<2x20x64xf32, #tpu.memory_space<vmem>>, vector<1x20x64xf32>
    %18 = vector.shape_cast %17 : vector<1x20x64xf32> to vector<20x64xf32>
    %19 = vector.shape_cast %16 : vector<20x64xf32> to vector<1x20x64xf32>
    tpu.vector_store %arg4[%c1_12, %c0_13, %c0_14], %19 {strides = array<i32>} : memref<2x20x64xf32, #tpu.memory_space<vmem>>, vector<1x20x64xf32>,
    return
  }
  func.func @transform_0(%arg0: i32, %arg1: i32) -> (i32, i32, i32) {
    %c0_i32 = arith.constant 0 : i32
    %c0_i32_0 = arith.constant 0 : i32
    return %arg0, %c0_i32, %arg1 : i32, i32, i32
  }
  func.func @transform_1(%arg0: i32, %arg1: i32) -> (i32, i32) {
    %c0_i32 = arith.constant 0 : i32
    %c0_i32_0 = arith.constant 0 : i32
    %c0_i32_1 = arith.constant 0 : i32
    return %c0_i32, %c0_i32_0 : i32, i32
  }
  func.func @transform_2(%arg0: i32, %arg1: i32) -> (i32, i32, i32) {
    %c0_i32 = arith.constant 0 : i32
    %c0_i32_0 = arith.constant 0 : i32
    return %arg0, %c0_i32, %arg1 : i32, i32, i32
  }
}

</mosaic_0001>

<bundles_post_ra>
// kernel: cam_head.1
= control target key start
LH: loop header
LB: loop body
LE: loop exit
PB: predicated region body
PF: predicated region fallthrough
CT: control target
= control target key end

     0   :  { %vm766_vm0 = vcmask 523264   ;;  %vm769_vm1 = vcmask 519168   ;;  %s3633_s0 = inlined_call_operand.vmem [shape: f32[2,2048,64], index: 0, kind: input, shape index: {}]   ;;  %s3634_s1 = inlined_call_operand.vmem [shape: f32[20,2048], index: 1, kind: input, shape index: {}]   ;;  %s3635_s2 = inlined_call_operand.vmem [shape: f32[2,20,64], index: 2, kind: output, shape index: {}]  }
   0x1   :  { %v105_v0 = vld [vmem:[%s3633_s0 + $0x70] sm:$0xff]  ;;  %v106_v1 = vld [vmem:[%s3633_s0 + $0x78] sm:$0xff]  ;;  %v103_v11 = vld [vmem:[%s3633_s0 + $0x60] sm:$0xff] }
   0x2   :  { %v121_v2 = vld [vmem:[%s3633_s0 + $0xf0] sm:$0xff]  ;;  %v354_v3 = vpack.c.bf16 %v106_v1, %v105_v0  ;;  %v122_v4 = vld [vmem:[%s3633_s0 + $0xf8] sm:$0xff]  ;;  %v104_v13 = vld [vmem:[%s3633_s0 + $0x68] sm:$0xff] }
   0x3   :  { %v137_v5 = vld [vmem:[%s3633_s0 + $0x170] sm:$0xff]  ;;  %v138_v6 = vld [vmem:[%s3633_s0 + $0x178] sm:$0xff]  ;;  %v362_v7 = vpack.c.bf16 %v122_v4, %v121_v2  ;;  %v119_v14 = vld [vmem:[%s3633_s0 + $0xe0] sm:$0xff]  ;;  %v353_v16 = vpack.c.bf16 %v104_v13, %v103_v11 }
   0x4   :  { %v370_v8 = vpack.c.bf16 %v138_v6, %v137_v5  ;;  %v153_v9 = vld [vmem:[%s3633_s0 + $0x1f0] sm:$0xff]  ;;  %v154_v10 = vld [vmem:[%s3633_s0 + $0x1f8] sm:$0xff]  ;;  %475 = vmatpush.bf16.msra.mxu0 %v354_v3  ;;  %v120_v15 = vld [vmem:[%s3633_s0 + $0xe8] sm:$0xff] }
   0x5   :  { %v378_v12 = vpack.c.bf16 %v154_v10, %v153_v9  ;;  %493 = vmatpush.bf16.msra.mxu1 %v362_v7  ;;  %v361_v17 = vpack.c.bf16 %v120_v15, %v119_v14  ;;  %v135_v18 = vld [vmem:[%s3633_s0 + $0x160] sm:$0xff]  ;;  %v136_v19 = vld [vmem:[%s3633_s0 + $0x168] sm:$0xff]  ;;  %v101_v23 = vld [vmem:[%s3633_s0 + $0x50] sm:$0xff] }
   0x6   :  { %511 = vmatpush.bf16.msra.mxu2 %v370_v8  ;;  %v151_v20 = vld [vmem:[%s3633_s0 + $0x1e0] sm:$0xff]  ;;  %v369_v21 = vpack.c.bf16 %v136_v19, %v135_v18  ;;  %v152_v22 = vld [vmem:[%s3633_s0 + $0x1e8] sm:$0xff]  ;;  %v102_v24 = vld [vmem:[%s3633_s0 + $0x58] sm:$0xff] }
   0x7   :  { %529 = vmatpush.bf16.msra.mxu3 %v378_v12  ;;  %v377_v25 = vpack.c.bf16 %v152_v22, %v151_v20  ;;  %v117_v26 = vld [vmem:[%s3633_s0 + $0xd0] sm:$0xff]  ;;  %v118_v27 = vld [vmem:[%s3633_s0 + $0xd8] sm:$0xff]  ;;  %v352_v29 = vpack.c.bf16 %v102_v24, %v101_v23  ;;  %v99_v35 = vld [vmem:[%s3633_s0 + $0x40] sm:$0xff] }
   0x8   :  { %v133_v28 = vld [vmem:[%s3633_s0 + $0x150] sm:$0xff]  ;;  %476 = vmatpush.bf16.msra.mxu0 %v353_v16  ;;  %v134_v30 = vld [vmem:[%s3633_s0 + $0x158] sm:$0xff]  ;;  %v360_v33 = vpack.c.bf16 %v118_v27, %v117_v26  ;;  %v100_v36 = vld [vmem:[%s3633_s0 + $0x48] sm:$0xff] }
   0x9   :  { %v149_v31 = vld [vmem:[%s3633_s0 + $0x1d0] sm:$0xff]  ;;  %v150_v32 = vld [vmem:[%s3633_s0 + $0x1d8] sm:$0xff]  ;;  %494 = vmatpush.bf16.msra.mxu1 %v361_v17  ;;  %v368_v34 = vpack.c.bf16 %v134_v30, %v133_v28  ;;  %v115_v37 = vld [vmem:[%s3633_s0 + $0xc0] sm:$0xff]  ;;  %v351_v44 = vpack.c.bf16 %v100_v36, %v99_v35 }
   0xa   :  { %512 = vmatpush.bf16.msra.mxu2 %v369_v21  ;;  %v376_v38 = vpack.c.bf16 %v150_v32, %v149_v31  ;;  %v116_v39 = vld [vmem:[%s3633_s0 + $0xc8] sm:$0xff]  ;;  %v131_v40 = vld [vmem:[%s3633_s0 + $0x140] sm:$0xff]  ;;  %v97_v47 = vld [vmem:[%s3633_s0 + $0x30] sm:$0xff] }
   0xb   :  { %530 = vmatpush.bf16.msra.mxu3 %v377_v25  ;;  %v132_v41 = vld [vmem:[%s3633_s0 + $0x148] sm:$0xff]  ;;  %v147_v42 = vld [vmem:[%s3633_s0 + $0x1c0] sm:$0xff]  ;;  %v359_v45 = vpack.c.bf16 %v116_v39, %v115_v37  ;;  %v98_v48 = vld [vmem:[%s3633_s0 + $0x38] sm:$0xff] }
   0xc   :  { %v148_v43 = vld [vmem:[%s3633_s0 + $0x1c8] sm:$0xff]  ;;  %477 = vmatpush.bf16.msra.mxu0 %v352_v29  ;;  %v367_v46 = vpack.c.bf16 %v132_v41, %v131_v40  ;;  %v113_v49 = vld [vmem:[%s3633_s0 + $0xb0] sm:$0xff]  ;;  %v114_v51 = vld [vmem:[%s3633_s0 + $0xb8] sm:$0xff]  ;;  %v350_v56 = vpack.c.bf16 %v98_v48, %v97_v47 }
   0xd   :  { %495 = vmatpush.bf16.msra.mxu1 %v360_v33  ;;  %v375_v50 = vpack.c.bf16 %v148_v43, %v147_v42  ;;  %v129_v52 = vld [vmem:[%s3633_s0 + $0x130] sm:$0xff]  ;;  %v130_v53 = vld [vmem:[%s3633_s0 + $0x138] sm:$0xff]  ;;  %v358_v57 = vpack.c.bf16 %v114_v51, %v113_v49  ;;  %v95_v59 = vld [vmem:[%s3633_s0 + $0x20] sm:$0xff] }
   0xe   :  { %513 = vmatpush.bf16.msra.mxu2 %v368_v34  ;;  %v145_v54 = vld [vmem:[%s3633_s0 + $0x1b0] sm:$0xff]  ;;  %v146_v55 = vld [vmem:[%s3633_s0 + $0x1b8] sm:$0xff]  ;;  %v366_v58 = vpack.c.bf16 %v130_v53, %v129_v52  ;;  %v96_v60 = vld [vmem:[%s3633_s0 + $0x28] sm:$0xff] }
   0xf   :  { %531 = vmatpush.bf16.msra.mxu3 %v376_v38  ;;  %v111_v61 = vld [vmem:[%s3633_s0 + $0xa0] sm:$0xff]  ;;  %v374_v62 = vpack.c.bf16 %v146_v55, %v145_v54  ;;  %v112_v63 = vld [vmem:[%s3633_s0 + $0xa8] sm:$0xff]  ;;  %v349_v4 = vpack.c.bf16 %v96_v60, %v95_v59  ;;  %v93_v7 = vld [vmem:[%s3633_s0 + $0x10] sm:$0xff] }
  0x10   :  { %478 = vmatpush.bf16.msra.mxu0 %v351_v44  ;;  %v127_v0 = vld [vmem:[%s3633_s0 + $0x120] sm:$0xff]  ;;  %v128_v1 = vld [vmem:[%s3633_s0 + $0x128] sm:$0xff]  ;;  %v357_v5 = vpack.c.bf16 %v112_v63, %v111_v61  ;;  %v94_v8 = vld [vmem:[%s3633_s0 + $0x18] sm:$0xff] }
  0x11   :  { %496 = vmatpush.bf16.msra.mxu1 %v359_v45  ;;  %v143_v2 = vld [vmem:[%s3633_s0 + $0x1a0] sm:$0xff]  ;;  %v144_v3 = vld [vmem:[%s3633_s0 + $0x1a8] sm:$0xff]  ;;  %v365_v6 = vpack.c.bf16 %v128_v1, %v127_v0  ;;  %v109_v9 = vld [vmem:[%s3633_s0 + $0x90] sm:$0xff]  ;;  %v348_v17 = vpack.c.bf16 %v94_v8, %v93_v7 }
  0x12   :  { %514 = vmatpush.bf16.msra.mxu2 %v367_v46  ;;  %v373_v10 = vpack.c.bf16 %v144_v3, %v143_v2  ;;  %v110_v11 = vld [vmem:[%s3633_s0 + $0x98] sm:$0xff]  ;;  %v125_v12 = vld [vmem:[%s3633_s0 + $0x110] sm:$0xff]  ;;  %v91_v16 = vld [vmem:[%s3633_s0] sm:$0xff] }
  0x13   :  { %532 = vmatpush.bf16.msra.mxu3 %v375_v50  ;;  %v126_v13 = vld [vmem:[%s3633_s0 + $0x118] sm:$0xff]  ;;  %v141_v14 = vld [vmem:[%s3633_s0 + $0x190] sm:$0xff]  ;;  %v92_v18 = vld [vmem:[%s3633_s0 + $0x8] sm:$0xff]  ;;  %v356_v21 = vpack.c.bf16 %v110_v11, %v109_v9 }
  0x14   :  { %479 = vmatpush.bf16.msra.mxu0 %v350_v56  ;;  %v142_v15 = vld [vmem:[%s3633_s0 + $0x198] sm:$0xff]  ;;  %v107_v19 = vld [vmem:[%s3633_s0 + $0x80] sm:$0xff]  ;;  %v108_v20 = vld [vmem:[%s3633_s0 + $0x88] sm:$0xff]  ;;  %v364_v22 = vpack.c.bf16 %v126_v13, %v125_v12  ;;  %v347_v34 = vpack.c.bf16 %v92_v18, %v91_v16 }
  0x15   :  { %497 = vmatpush.bf16.msra.mxu1 %v358_v57  ;;  %v123_v23 = vld [vmem:[%s3633_s0 + $0x100] sm:$0xff]  ;;  %v124_v24 = vld [vmem:[%s3633_s0 + $0x108] sm:$0xff]  ;;  %v372_v26 = vpack.c.bf16 %v142_v15, %v141_v14  ;;  %v201_v32 = vld [vmem:[%s3633_s0 + $0x370] sm:$0xff]  ;;  %v355_v38 = vpack.c.bf16 %v108_v20, %v107_v19 }
  0x16   :  { %515 = vmatpush.bf16.msra.mxu2 %v366_v58  ;;  %v139_v25 = vld [vmem:[%s3633_s0 + $0x180] sm:$0xff]  ;;  %v140_v27 = vld [vmem:[%s3633_s0 + $0x188] sm:$0xff]  ;;  %v202_v33 = vld [vmem:[%s3633_s0 + $0x378] sm:$0xff]  ;;  %v363_v39 = vpack.c.bf16 %v124_v24, %v123_v23 }
  0x17   :  { %533 = vmatpush.bf16.msra.mxu3 %v374_v62  ;;  %v11_v28 = vld [vmem:[%s3634_s1] sm:$0xff]  ;;  %v12_v30 = vld [vmem:[%s3634_s1 + $0x8] sm:$0xff]  ;;  %v13_v35 = vld [vmem:[%s3634_s1 + $0x10] sm:$0xff]  ;;  %v371_v43 = vpack.c.bf16 %v140_v27, %v139_v25  ;;  %v402_v44 = vpack.c.bf16 %v202_v33, %v201_v32 }
  0x18   :  { %480 = vmatpush.bf16.msra.mxu0 %v349_v4  ;;  %v27_v29 = vld [vmem:[%s3634_s1 + $0x80] sm:$0xff]  ;;  %v28_v31 = vld [vmem:[%s3634_s1 + $0x88] sm:$0xff]  ;;  %v217_v36 = vld [vmem:[%s3633_s0 + $0x3f0] sm:$0xff] }
  0x19   :  { %498 = vmatpush.bf16.msra.mxu1 %v357_v5  ;;  %v218_v37 = vld [vmem:[%s3633_s0 + $0x3f8] sm:$0xff]  ;;  %v29_v40 = vld [vmem:[%s3634_s1 + $0x90] sm:$0xff]  ;;  %v1966_v48 = vpack.c.bf16 %v27_v29, %v11_v28  ;;  %v199_v51 = vld [vmem:[%s3633_s0 + $0x360] sm:$0xff]  ;;  %v1977_v53 = vpack.c.bf16 %v28_v31, %v12_v30 }
  0x1a   :  { %516 = vmatpush.bf16.msra.mxu2 %v365_v6  ;;  %v14_v41 = vld [vmem:[%s3634_s1 + $0x18] sm:$0xff]  ;;  %v169_v45 = vld [vmem:[%s3633_s0 + $0x270] sm:$0xff]  ;;  %v410_v49 = vpack.c.bf16 %v218_v37, %v217_v36  ;;  %v200_v52 = vld [vmem:[%s3633_s0 + $0x368] sm:$0xff]  ;;  %v1979_v54 = vpack.c.bf16 %v29_v40, %v13_v35 }
  0x1b   :  { %534 = vmatpush.bf16.msra.mxu3 %v373_v10  ;;  %v30_v42 = vld [vmem:[%s3634_s1 + $0x98] sm:$0xff]  ;;  %v185_v47 = vld [vmem:[%s3633_s0 + $0x2f0] sm:$0xff]  ;;  %v215_v55 = vld [vmem:[%s3633_s0 + $0x3e0] sm:$0xff]  ;;  %v401_v60 = vpack.c.bf16 %v200_v52, %v199_v51 }
  0x1c   :  { %481 = vmatpush.bf16.msra.mxu0 %v348_v17  ;;  %v170_v46 = vld [vmem:[%s3633_s0 + $0x278] sm:$0xff]  ;;  %v216_v56 = vld [vmem:[%s3633_s0 + $0x3e8] sm:$0xff]  ;;  %v1987_v57 = vpack.c.bf16 %v30_v42, %v14_v41  ;;  %v167_v61 = vld [vmem:[%s3633_s0 + $0x260] sm:$0xff] }
  0x1d   :  { %499 = vmatpush.bf16.msra.mxu1 %v356_v21  ;;  %v186_v50 = vld [vmem:[%s3633_s0 + $0x2f8] sm:$0xff]  ;;  %v386_v58 = vpack.c.bf16 %v170_v46, %v169_v45  ;;  %v168_v62 = vld [vmem:[%s3633_s0 + $0x268] sm:$0xff]  ;;  %v183_v63 = vld [vmem:[%s3633_s0 + $0x2e0] sm:$0xff]  ;;  %v409_v0 = vpack.c.bf16 %v216_v56, %v215_v55 }
  0x1e   :  { %517 = vmatpush.bf16.msra.mxu2 %v364_v22  ;;  %v394_v59 = vpack.c.bf16 %v186_v50, %v185_v47  ;;  %v184_v1 = vld [vmem:[%s3633_s0 + $0x2e8] sm:$0xff]  ;;  %v197_v2 = vld [vmem:[%s3633_s0 + $0x350] sm:$0xff]  ;;  %v198_v3 = vld [vmem:[%s3633_s0 + $0x358] sm:$0xff]  ;;  %v385_v6 = vpack.c.bf16 %v168_v62, %v167_v61 }
  0x1f   :  { %535 = vmatpush.bf16.msra.mxu3 %v372_v26  ;;  %v213_v4 = vld [vmem:[%s3633_s0 + $0x3d0] sm:$0xff]  ;;  %v214_v5 = vld [vmem:[%s3633_s0 + $0x3d8] sm:$0xff]  ;;  %v393_v7 = vpack.c.bf16 %v184_v1, %v183_v63  ;;  %v400_v8 = vpack.c.bf16 %v198_v3, %v197_v2  ;;  %v195_v14 = vld [vmem:[%s3633_s0 + $0x340] sm:$0xff] }
  0x20   :  { %482 = vmatpush.bf16.msra.mxu0 %v347_v34  ;;  %v165_v9 = vld [vmem:[%s3633_s0 + $0x250] sm:$0xff]  ;;  %v166_v10 = vld [vmem:[%s3633_s0 + $0x258] sm:$0xff]  ;;  %v408_v12 = vpack.c.bf16 %v214_v5, %v213_v4  ;;  %v196_v15 = vld [vmem:[%s3633_s0 + $0x348] sm:$0xff] }
  0x21   :  { %500 = vmatpush.bf16.msra.mxu1 %v355_v38  ;;  %v181_v11 = vld [vmem:[%s3633_s0 + $0x2d0] sm:$0xff]  ;;  %v182_v13 = vld [vmem:[%s3633_s0 + $0x2d8] sm:$0xff]  ;;  %v211_v16 = vld [vmem:[%s3633_s0 + $0x3c0] sm:$0xff]  ;;  %v384_v18 = vpack.c.bf16 %v166_v10, %v165_v9  ;;  %v399_v20 = vpack.c.bf16 %v196_v15, %v195_v14 }
  0x22   :  { %518 = vmatpush.bf16.msra.mxu2 %v363_v39  ;;  %v212_v17 = vld [vmem:[%s3633_s0 + $0x3c8] sm:$0xff]  ;;  %v392_v19 = vpack.c.bf16 %v182_v13, %v181_v11  ;;  %v163_v21 = vld [vmem:[%s3633_s0 + $0x240] sm:$0xff]  ;;  %v193_v26 = vld [vmem:[%s3633_s0 + $0x330] sm:$0xff] }
  0x23   :  { %536 = vmatpush.bf16.msra.mxu3 %v371_v43  ;;  %483 = vmatmul.bf16.vlgmr.msra.gmra.mxu0 %v1966_v48  ;;  %v164_v22 = vld [vmem:[%s3633_s0 + $0x248] sm:$0xff]  ;;  %v179_v23 = vld [vmem:[%s3633_s0 + $0x2c0] sm:$0xff]  ;;  %v407_v24 = vpack.c.bf16 %v212_v17, %v211_v16  ;;  %v194_v27 = vld [vmem:[%s3633_s0 + $0x338] sm:$0xff] }
  0x24   :  { %501 = vmatmul.bf16.vlgmr.msra.gmra.mxu1 %v1977_v53  ;;  %547 = vmatpush.bf16.msrb.mxu0 %v386_v58  ;;  %v180_v25 = vld [vmem:[%s3633_s0 + $0x2c8] sm:$0xff]  ;;  %v43_v28 = vld [vmem:[%s3634_s1 + $0x100] sm:$0xf]  ;;  %v209_v29 = vld [vmem:[%s3633_s0 + $0x3b0] sm:$0xff]  ;;  %v383_v31 = vpack.c.bf16 %v164_v22, %v163_v21  ;;  %v398_v36 = vpack.c.bf16 %v194_v27, %v193_v26 }
  0x25   :  { %519 = vmatmul.bf16.vlgmr.msra.gmra.mxu2 %v1979_v54  ;;  %565 = vmatpush.bf16.msrb.mxu1 %v394_v59  ;;  %v210_v30 = vld [vmem:[%s3633_s0 + $0x3b8] sm:$0xff]  ;;  %v44_v32 = vld [vmem:[%s3634_s1 + $0x108] sm:$0xf]  ;;  %v45_v33 = vld [vmem:[%s3634_s1 + $0x110] sm:$0xf]  ;;  %v391_v35 = vpack.c.bf16 %v180_v25, %v179_v23  ;;  %v2086_v40 = vpack.c.bf16 %v43_v28, %v43_v28 }
  0x26   :  { %583 = vmatpush.bf16.msrb.mxu2 %v402_v44  ;;  %537 = vmatmul.bf16.vlgmr.msra.gmra.mxu3 %v1987_v57  ;;  %v46_v34 = vld [vmem:[%s3634_s1 + $0x118] sm:$0xf]  ;;  %v161_v37 = vld [vmem:[%s3633_s0 + $0x230] sm:$0xff]  ;;  %v406_v41 = vpack.c.bf16 %v210_v30, %v209_v29  ;;  %v191_v43 = vld [vmem:[%s3633_s0 + $0x320] sm:$0xff]  ;;  %v2097_v45 = vpack.c.bf16 %v44_v32, %v44_v32  ;;  %v2099_v46 = vpack.c.bf16 %v45_v33, %v45_v33 }
  0x27   :  { %601 = vmatpush.bf16.msrb.mxu3 %v410_v49  ;;  %v162_v38 = vld [vmem:[%s3633_s0 + $0x238] sm:$0xff]  ;;  %v177_v39 = vld [vmem:[%s3633_s0 + $0x2b0] sm:$0xff]  ;;  %v192_v44 = vld [vmem:[%s3633_s0 + $0x328] sm:$0xff]  ;;  %v2107_v50 = vpack.c.bf16 %v46_v34, %v46_v34 }
  0x28   :  { %548 = vmatpush.bf16.msrb.mxu0 %v385_v6  ;;  %v178_v42 = vld [vmem:[%s3633_s0 + $0x2b8] sm:$0xff]  ;;  %v207_v47 = vld [vmem:[%s3633_s0 + $0x3a0] sm:$0xff]  ;;  %v208_v49 = vld [vmem:[%s3633_s0 + $0x3a8] sm:$0xff]  ;;  %v382_v51 = vpack.c.bf16 %v162_v38, %v161_v37  ;;  %v397_v55 = vpack.c.bf16 %v192_v44, %v191_v43 }
  0x29   :  { %566 = vmatpush.bf16.msrb.mxu1 %v393_v7  ;;  %v390_v52 = vpack.c.bf16 %v178_v42, %v177_v39  ;;  %v159_v56 = vld [vmem:[%s3633_s0 + $0x220] sm:$0xff]  ;;  %v160_v58 = vld [vmem:[%s3633_s0 + $0x228] sm:$0xff]  ;;  %v189_v62 = vld [vmem:[%s3633_s0 + $0x310] sm:$0xff] }
  0x2a   :  { %584 = vmatpush.bf16.msrb.mxu2 %v401_v60  ;;  %v175_v59 = vld [vmem:[%s3633_s0 + $0x2a0] sm:$0xff]  ;;  %v405_v60 = vpack.c.bf16 %v208_v49, %v207_v47  ;;  %v176_v61 = vld [vmem:[%s3633_s0 + $0x2a8] sm:$0xff]  ;;  %v190_v63 = vld [vmem:[%s3633_s0 + $0x318] sm:$0xff]  ;;  %v381_v2 = vpack.c.bf16 %v160_v58, %v159_v56 }
  0x2b   :  { %602 = vmatpush.bf16.msrb.mxu3 %v409_v0  ;;  %v205_v0 = vld [vmem:[%s3633_s0 + $0x390] sm:$0xff]  ;;  %v206_v1 = vld [vmem:[%s3633_s0 + $0x398] sm:$0xff]  ;;  %v389_v4 = vpack.c.bf16 %v176_v61, %v175_v59  ;;  %v396_v5 = vpack.c.bf16 %v190_v63, %v189_v62  ;;  %v187_v10 = vld [vmem:[%s3633_s0 + $0x300] sm:$0xff] }
  0x2c   :  { %549 = vmatpush.bf16.msrb.mxu0 %v384_v18  ;;  %v157_v3 = vld [vmem:[%s3633_s0 + $0x210] sm:$0xff]  ;;  %v158_v6 = vld [vmem:[%s3633_s0 + $0x218] sm:$0xff]  ;;  %v404_v9 = vpack.c.bf16 %v206_v1, %v205_v0  ;;  %v188_v11 = vld [vmem:[%s3633_s0 + $0x308] sm:$0xff] }
  0x2d   :  { %567 = vmatpush.bf16.msrb.mxu1 %v392_v19  ;;  %v173_v7 = vld [vmem:[%s3633_s0 + $0x290] sm:$0xff]  ;;  %v204_v13 = vld [vmem:[%s3633_s0 + $0x388] sm:$0xff]  ;;  %v266_v15 = vld [vmem:[%s3633_s0 + $0x578] sm:$0xff]  ;;  %v380_v16 = vpack.c.bf16 %v158_v6, %v157_v3  ;;  %v395_v21 = vpack.c.bf16 %v188_v11, %v187_v10 }
  0x2e   :  { %585 = vmatpush.bf16.msrb.mxu2 %v400_v8  ;;  %v174_v8 = vld [vmem:[%s3633_s0 + $0x298] sm:$0xff]  ;;  %v265_v14 = vld [vmem:[%s3633_s0 + $0x570] sm:$0xff]  ;;  %v155_v17 = vld [vmem:[%s3633_s0 + $0x200] sm:$0xff] }
  0x2f   :  { %603 = vmatpush.bf16.msrb.mxu3 %v408_v12  ;;  %v203_v12 = vld [vmem:[%s3633_s0 + $0x380] sm:$0xff]  ;;  %v281_v18 = vld [vmem:[%s3633_s0 + $0x5f0] sm:$0xff]  ;;  %v282_v19 = vld [vmem:[%s3633_s0 + $0x5f8] sm:$0xff]  ;;  %v434_v28 = vpack.c.bf16 %v266_v15, %v265_v14 }
  0x30   :  { %550 = vmatpush.bf16.msrb.mxu0 %v383_v31  ;;  %v156_v22 = vld [vmem:[%s3633_s0 + $0x208] sm:$0xff]  ;;  %v171_v23 = vld [vmem:[%s3633_s0 + $0x280] sm:$0xff]  ;;  %v403_v25 = vpack.c.bf16 %v204_v13, %v203_v12  ;;  %v233_v29 = vld [vmem:[%s3633_s0 + $0x470] sm:$0xff]  ;;  %v442_v34 = vpack.c.bf16 %v282_v19, %v281_v18 }
  0x31   :  { %568 = vmatpush.bf16.msrb.mxu1 %v391_v35  ;;  %v15_v26 = vld [vmem:[%s3634_s1 + $0x20] sm:$0xff]  ;;  %v234_v30 = vld [vmem:[%s3633_s0 + $0x478] sm:$0xff]  ;;  %v249_v31 = vld [vmem:[%s3633_s0 + $0x4f0] sm:$0xff]  ;;  %v379_v38 = vpack.c.bf16 %v156_v22, %v155_v17 }
  0x32   :  { %586 = vmatpush.bf16.msrb.mxu2 %v399_v20  ;;  %v388_v20 = vpack.c.bf16 %v174_v8, %v173_v7  ;;  %v31_v27 = vld [vmem:[%s3634_s1 + $0xa0] sm:$0xff]  ;;  %v16_v32 = vld [vmem:[%s3634_s1 + $0x28] sm:$0xff]  ;;  %v250_v35 = vld [vmem:[%s3633_s0 + $0x4f8] sm:$0xff]  ;;  %v418_v47 = vpack.c.bf16 %v234_v30, %v233_v29 }
  0x33   :  { %604 = vmatpush.bf16.msrb.mxu3 %v407_v24  ;;  %488 = vmatmul.bf16.gmra.mxu0 %v2086_v40  ;;  %v172_v24 = vld [vmem:[%s3633_s0 + $0x288] sm:$0xff]  ;;  %v17_v39 = vld [vmem:[%s3634_s1 + $0x30] sm:$0xff]  ;;  %v18_v42 = vld [vmem:[%s3634_s1 + $0x38] sm:$0xff] }
  0x34   :  { %506 = vmatmul.bf16.gmra.mxu1 %v2097_v45  ;;  %551 = vmatpush.bf16.msrb.mxu0 %v382_v51  ;;  %v32_v33 = vld [vmem:[%s3634_s1 + $0xa8] sm:$0xff]  ;;  %v387_v43 = vpack.c.bf16 %v172_v24, %v171_v23  ;;  %v34_v44 = vld [vmem:[%s3634_s1 + $0xb8] sm:$0xff]  ;;  %v279_v49 = vld [vmem:[%s3633_s0 + $0x5e0] sm:$0xff] }
  0x35   :  { %524 = vmatmul.bf16.gmra.mxu2 %v2099_v46  ;;  %569 = vmatpush.bf16.msrb.mxu1 %v390_v52  ;;  %v264_v37 = vld [vmem:[%s3633_s0 + $0x568] sm:$0xff]  ;;  %v426_v52 = vpack.c.bf16 %v250_v35, %v249_v31  ;;  %v231_v56 = vld [vmem:[%s3633_s0 + $0x460] sm:$0xff]  ;;  %v261_v63 = vld [vmem:[%s3633_s0 + $0x550] sm:$0xff]  ;;  %v2255_v1 = vpack.c.bf16 %v32_v33, %v16_v32 }
  0x36   :  { %587 = vmatpush.bf16.msrb.mxu2 %v398_v36  ;;  %542 = vmatmul.bf16.gmra.mxu3 %v2107_v50  ;;  %v263_v36 = vld [vmem:[%s3633_s0 + $0x560] sm:$0xff]  ;;  %v280_v51 = vld [vmem:[%s3633_s0 + $0x5e8] sm:$0xff]  ;;  %v262_v0 = vld [vmem:[%s3633_s0 + $0x558] sm:$0xff] }
  0x37   :  { %605 = vmatpush.bf16.msrb.mxu3 %v406_v41  ;;  %v33_v41 = vld [vmem:[%s3634_s1 + $0xb0] sm:$0xff]  ;;  %v232_v58 = vld [vmem:[%s3633_s0 + $0x468] sm:$0xff]  ;;  %v247_v59 = vld [vmem:[%s3633_s0 + $0x4e0] sm:$0xff]  ;;  %v441_v3 = vpack.c.bf16 %v280_v51, %v279_v49  ;;  %v432_v8 = vpack.c.bf16 %v262_v0, %v261_v63 }
  0x38   :  { %552 = vmatpush.bf16.msrb.mxu0 %v381_v2  ;;  %v2244_v61 = vpack.c.bf16 %v33_v41, %v17_v39  ;;  %v248_v62 = vld [vmem:[%s3633_s0 + $0x4e8] sm:$0xff]  ;;  %v2257_v2 = vpack.c.bf16 %v34_v44, %v18_v42  ;;  %v278_v6 = vld [vmem:[%s3633_s0 + $0x5d8] sm:$0xff]  ;;  %v245_v11 = vld [vmem:[%s3633_s0 + $0x4d0] sm:$0xff] }
  0x39   :  { %570 = vmatpush.bf16.msrb.mxu1 %v389_v4  ;;  %v417_v4 = vpack.c.bf16 %v232_v58, %v231_v56  ;;  %v425_v7 = vpack.c.bf16 %v248_v62, %v247_v59  ;;  %v230_v10 = vld [vmem:[%s3633_s0 + $0x458] sm:$0xff]  ;;  %v259_v13 = vld [vmem:[%s3633_s0 + $0x540] sm:$0xff]  ;;  %v260_v14 = vld [vmem:[%s3633_s0 + $0x548] sm:$0xff] }
  0x3a   :  { %588 = vmatpush.bf16.msrb.mxu2 %v397_v55  ;;  %v433_v55 = vpack.c.bf16 %v264_v37, %v263_v36  ;;  %v246_v12 = vld [vmem:[%s3633_s0 + $0x4d8] sm:$0xff]  ;;  %v275_v17 = vld [vmem:[%s3633_s0 + $0x5c0] sm:$0xff]  ;;  %v276_v18 = vld [vmem:[%s3633_s0 + $0x5c8] sm:$0xff] }
  0x3b   :  { %606 = vmatpush.bf16.msrb.mxu3 %v405_v60  ;;  %v2242_v60 = vpack.c.bf16 %v31_v27, %v15_v26  ;;  %v424_v19 = vpack.c.bf16 %v246_v12, %v245_v11  ;;  %v228_v22 = vld [vmem:[%s3633_s0 + $0x448] sm:$0xff]  ;;  %v243_v23 = vld [vmem:[%s3633_s0 + $0x4c0] sm:$0xff]  ;;  %v258_v26 = vld [vmem:[%s3633_s0 + $0x538] sm:$0xff]  ;;  %v439_v27 = vpack.c.bf16 %v276_v18, %v275_v17 }
  0x3c   :  { %553 = vmatpush.bf16.msrb.mxu0 %v380_v16  ;;  %v244_v24 = vld [vmem:[%s3633_s0 + $0x4c8] sm:$0xff]  ;;  %v273_v29 = vld [vmem:[%s3633_s0 + $0x5b0] sm:$0xff]  ;;  %v274_v30 = vld [vmem:[%s3633_s0 + $0x5b8] sm:$0xff] }
  0x3d   :  { %571 = vmatpush.bf16.msrb.mxu1 %v388_v20  ;;  %v431_v20 = vpack.c.bf16 %v260_v14, %v259_v13  ;;  %v423_v31 = vpack.c.bf16 %v244_v24, %v243_v23  ;;  %v225_v33 = vld [vmem:[%s3633_s0 + $0x430] sm:$0xff]  ;;  %v242_v36 = vld [vmem:[%s3633_s0 + $0x4b8] sm:$0xff]  ;;  %v255_v37 = vld [vmem:[%s3633_s0 + $0x520] sm:$0xff]  ;;  %v438_v44 = vpack.c.bf16 %v274_v30, %v273_v29 }
  0x3e   :  { %589 = vmatpush.bf16.msrb.mxu2 %v396_v5  ;;  %v277_v5 = vld [vmem:[%s3633_s0 + $0x5d0] sm:$0xff]  ;;  %v47_v39 = vld [vmem:[%s3634_s1 + $0x120] sm:$0xf]  ;;  %v48_v41 = vld [vmem:[%s3634_s1 + $0x128] sm:$0xf] }
  0x3f   :  { %607 = vmatpush.bf16.msrb.mxu3 %v404_v9  ;;  %v229_v9 = vld [vmem:[%s3633_s0 + $0x450] sm:$0xff]  ;;  %v440_v15 = vpack.c.bf16 %v278_v6, %v277_v5  ;;  %v271_v49 = vld [vmem:[%s3633_s0 + $0x5a0] sm:$0xff]  ;;  %v272_v51 = vld [vmem:[%s3633_s0 + $0x5a8] sm:$0xff]  ;;  %v2362_v62 = vpack.c.bf16 %v47_v39, %v47_v39  ;;  %v2375_v5 = vpack.c.bf16 %v48_v41, %v48_v41 }
  0x40   :  { %554 = vmatpush.bf16.msrb.mxu0 %v379_v38  ;;  %v416_v16 = vpack.c.bf16 %v230_v10, %v229_v9  ;;  %v241_v35 = vld [vmem:[%s3633_s0 + $0x4b0] sm:$0xff]  ;;  %v256_v38 = vld [vmem:[%s3633_s0 + $0x528] sm:$0xff]  ;;  %v223_v56 = vld [vmem:[%s3633_s0 + $0x420] sm:$0xff] }
  0x41   :  { %572 = vmatpush.bf16.msrb.mxu1 %v387_v43  ;;  %v49_v42 = vld [vmem:[%s3634_s1 + $0x130] sm:$0xf]  ;;  %v50_v43 = vld [vmem:[%s3634_s1 + $0x138] sm:$0xf]  ;;  %v224_v58 = vld [vmem:[%s3633_s0 + $0x428] sm:$0xff] }
  0x42   :  { %590 = vmatpush.bf16.msrb.mxu2 %v395_v21  ;;  %v227_v21 = vld [vmem:[%s3633_s0 + $0x440] sm:$0xff]  ;;  %v2364_v63 = vpack.c.bf16 %v49_v42, %v49_v42  ;;  %v240_v0 = vld [vmem:[%s3633_s0 + $0x4a8] sm:$0xff]  ;;  %v2377_v6 = vpack.c.bf16 %v50_v43, %v50_v43  ;;  %v269_v9 = vld [vmem:[%s3633_s0 + $0x590] sm:$0xff] }
  0x43   :  { %608 = vmatpush.bf16.msrb.mxu3 %v403_v25  ;;  %555 = vmatmul.bf16.vlgmr.msrb.gmra.mxu0 %v2242_v60  ;;  %v257_v25 = vld [vmem:[%s3633_s0 + $0x530] sm:$0xff]  ;;  %v239_v59 = vld [vmem:[%s3633_s0 + $0x4a0] sm:$0xff]  ;;  %v270_v10 = vld [vmem:[%s3633_s0 + $0x598] sm:$0xff] }
  0x44   :  { %619 = vmatpush.bf16.msra.mxu0 %v418_v47  ;;  %573 = vmatmul.bf16.vlgmr.msrb.gmra.mxu1 %v2255_v1  ;;  %v430_v32 = vpack.c.bf16 %v258_v26, %v257_v25  ;;  %v421_v11 = vpack.c.bf16 %v240_v0, %v239_v59  ;;  %v221_v13 = vld [vmem:[%s3633_s0 + $0x410] sm:$0xff]  ;;  %v222_v14 = vld [vmem:[%s3633_s0 + $0x418] sm:$0xff]  ;;  %v251_v17 = vld [vmem:[%s3633_s0 + $0x500] sm:$0xff] }
  0x45   :  { %637 = vmatpush.bf16.msra.mxu1 %v426_v52  ;;  %591 = vmatmul.bf16.vlgmr.msrb.gmra.mxu2 %v2244_v61  ;;  %v422_v52 = vpack.c.bf16 %v242_v36, %v241_v35  ;;  %v252_v18 = vld [vmem:[%s3633_s0 + $0x508] sm:$0xff]  ;;  %v267_v23 = vld [vmem:[%s3633_s0 + $0x580] sm:$0xff]  ;;  %v298_v35 = vld [vmem:[%s3633_s0 + $0x678] sm:$0xff] }
  0x46   :  { %655 = vmatpush.bf16.msra.mxu2 %v434_v28  ;;  %609 = vmatmul.bf16.vlgmr.msrb.gmra.mxu3 %v2257_v2  ;;  %v415_v28 = vpack.c.bf16 %v228_v22, %v227_v21  ;;  %v436_v21 = vpack.c.bf16 %v270_v10, %v269_v9  ;;  %v412_v22 = vpack.c.bf16 %v222_v14, %v221_v13  ;;  %v268_v24 = vld [vmem:[%s3633_s0 + $0x588] sm:$0xff]  ;;  %v219_v25 = vld [vmem:[%s3633_s0 + $0x400] sm:$0xff]  ;;  %v313_v36 = vld [vmem:[%s3633_s0 + $0x6f0] sm:$0xff] }
  0x47   :  { %673 = vmatpush.bf16.msra.mxu3 %v442_v34  ;;  %v226_v34 = vld [vmem:[%s3633_s0 + $0x438] sm:$0xff]  ;;  %v235_v29 = vld [vmem:[%s3633_s0 + $0x480] sm:$0xff]  ;;  %v236_v30 = vld [vmem:[%s3633_s0 + $0x488] sm:$0xff] }
  0x48   :  { %620 = vmatpush.bf16.msra.mxu0 %v417_v4  ;;  %v414_v47 = vpack.c.bf16 %v226_v34, %v225_v33  ;;  %v254_v4 = vld [vmem:[%s3633_s0 + $0x518] sm:$0xff]  ;;  %v297_v34 = vld [vmem:[%s3633_s0 + $0x670] sm:$0xff]  ;;  %v327_v41 = vld [vmem:[%s3633_s0 + $0x760] sm:$0xff]  ;;  %v419_v43 = vpack.c.bf16 %v236_v30, %v235_v29 }
  0x49   :  { %638 = vmatpush.bf16.msra.mxu1 %v425_v7  ;;  %v437_v7 = vpack.c.bf16 %v272_v51, %v271_v49  ;;  %v346_v33 = vld [vmem:[%s3633_s0 + $0x7f8] sm:$0xff]  ;;  %v328_v42 = vld [vmem:[%s3633_s0 + $0x768] sm:$0xff]  ;;  %v21_v0 = vld [vmem:[%s3634_s1 + $0x50] sm:$0xff] }
  0x4a   :  { %656 = vmatpush.bf16.msra.mxu2 %v433_v55  ;;  %v429_v55 = vpack.c.bf16 %v256_v38, %v255_v37  ;;  %v314_v37 = vld [vmem:[%s3633_s0 + $0x6f8] sm:$0xff]  ;;  %v435_v38 = vpack.c.bf16 %v268_v24, %v267_v23  ;;  %v20_v51 = vld [vmem:[%s3634_s1 + $0x48] sm:$0xff]  ;;  %v295_v9 = vld [vmem:[%s3633_s0 + $0x660] sm:$0xff] }
  0x4b   :  { %674 = vmatpush.bf16.msra.mxu3 %v441_v3  ;;  %v253_v3 = vld [vmem:[%s3633_s0 + $0x510] sm:$0xff]  ;;  %v344_v59 = vld [vmem:[%s3633_s0 + $0x7e8] sm:$0xff]  ;;  %v310_v29 = vld [vmem:[%s3633_s0 + $0x6d8] sm:$0xff] }
  0x4c   :  { %621 = vmatpush.bf16.msra.mxu0 %v416_v16  ;;  %v428_v12 = vpack.c.bf16 %v254_v4, %v253_v3  ;;  %v238_v16 = vld [vmem:[%s3633_s0 + $0x498] sm:$0xff]  ;;  %v37_v3 = vld [vmem:[%s3634_s1 + $0xd0] sm:$0xff]  ;;  %v296_v10 = vld [vmem:[%s3633_s0 + $0x668] sm:$0xff] }
  0x4d   :  { %639 = vmatpush.bf16.msra.mxu1 %v424_v19  ;;  %v329_v19 = vld [vmem:[%s3633_s0 + $0x770] sm:$0xff]  ;;  %v22_v4 = vld [vmem:[%s3634_s1 + $0x58] sm:$0xff]  ;;  %v312_v13 = vld [vmem:[%s3633_s0 + $0x6e8] sm:$0xff] }
  0x4e   :  { %657 = vmatpush.bf16.msra.mxu2 %v432_v8  ;;  %v413_v8 = vpack.c.bf16 %v224_v58, %v223_v56  ;;  %v458_v56 = vpack.c.bf16 %v314_v37, %v313_v36  ;;  %v343_v58 = vld [vmem:[%s3633_s0 + $0x7e0] sm:$0xff]  ;;  %v325_v14 = vld [vmem:[%s3633_s0 + $0x750] sm:$0xff]  ;;  %v292_v37 = vld [vmem:[%s3633_s0 + $0x648] sm:$0xff] }
  0x4f   :  { %675 = vmatpush.bf16.msra.mxu3 %v440_v15  ;;  %v237_v15 = vld [vmem:[%s3633_s0 + $0x490] sm:$0xff]  ;;  %v323_v30 = vld [vmem:[%s3633_s0 + $0x740] sm:$0xff] }
  0x50   :  { %622 = vmatpush.bf16.msra.mxu0 %v415_v28  ;;  %v420_v26 = vpack.c.bf16 %v238_v16, %v237_v15  ;;  %v220_v28 = vld [vmem:[%s3633_s0 + $0x408] sm:$0xff]  ;;  %v2502_v16 = vpack.c.bf16 %v37_v3, %v21_v0  ;;  %v293_v24 = vld [vmem:[%s3633_s0 + $0x650] sm:$0xff]  ;;  %v291_v36 = vld [vmem:[%s3633_s0 + $0x640] sm:$0xff] }
  0x51   :  { %640 = vmatpush.bf16.msra.mxu1 %v423_v31  ;;  %v411_v39 = vpack.c.bf16 %v220_v28, %v219_v25  ;;  %v294_v25 = vld [vmem:[%s3633_s0 + $0x658] sm:$0xff]  ;;  %v309_v28 = vld [vmem:[%s3633_s0 + $0x6d0] sm:$0xff] }
  0x52   :  { %658 = vmatpush.bf16.msra.mxu2 %v431_v20  ;;  %v330_v20 = vld [vmem:[%s3633_s0 + $0x778] sm:$0xff]  ;;  %v305_v0 = vld [vmem:[%s3633_s0 + $0x6b0] sm:$0xff] }
  0x53   :  { %676 = vmatpush.bf16.msra.mxu3 %v439_v27  ;;  %560 = vmatmul.bf16.gmra.mxu0 %v2362_v62  ;;  %v427_v27 = vpack.c.bf16 %v252_v18, %v251_v17  ;;  %v466_v31 = vpack.c.bf16 %v330_v20, %v329_v19  ;;  %v326_v17 = vld [vmem:[%s3633_s0 + $0x758] sm:$0xff]  ;;  %v341_v18 = vld [vmem:[%s3633_s0 + $0x7d0] sm:$0xff] }
  0x54   :  { %623 = vmatpush.bf16.msra.mxu0 %v414_v47  ;;  %578 = vmatmul.bf16.gmra.mxu1 %v2375_v5  ;;  %v35_v47 = vld [vmem:[%s3634_s1 + $0xc0] sm:$0xff]  ;;  %v342_v19 = vld [vmem:[%s3633_s0 + $0x7d8] sm:$0xff] }
  0x55   :  { %641 = vmatpush.bf16.msra.mxu1 %v422_v52  ;;  %596 = vmatmul.bf16.gmra.mxu2 %v2364_v63  ;;  %v36_v52 = vld [vmem:[%s3634_s1 + $0xc8] sm:$0xff]  ;;  %v306_v3 = vld [vmem:[%s3633_s0 + $0x6b8] sm:$0xff] }
  0x56   :  { %659 = vmatpush.bf16.msra.mxu2 %v430_v32  ;;  %614 = vmatmul.bf16.gmra.mxu3 %v2377_v6  ;;  %v345_v32 = vld [vmem:[%s3633_s0 + $0x7f0] sm:$0xff]  ;;  %v2513_v20 = vpack.c.bf16 %v36_v52, %v20_v51  ;;  %v447_v51 = vpack.c.bf16 %v292_v37, %v291_v36  ;;  %v286_v37 = vld [vmem:[%s3633_s0 + $0x618] sm:$0xff] }
  0x57   :  { %677 = vmatpush.bf16.msra.mxu3 %v438_v44  ;;  %v19_v44 = vld [vmem:[%s3634_s1 + $0x40] sm:$0xff]  ;;  %v474_v49 = vpack.c.bf16 %v346_v33, %v345_v32  ;;  %v340_v33 = vld [vmem:[%s3633_s0 + $0x7c8] sm:$0xff]  ;;  %v285_v36 = vld [vmem:[%s3633_s0 + $0x610] sm:$0xff] }
  0x58   :  { %624 = vmatpush.bf16.msra.mxu0 %v413_v8  ;;  %v38_v8 = vld [vmem:[%s3634_s1 + $0xd8] sm:$0xff]  ;;  %v2500_v15 = vpack.c.bf16 %v35_v47, %v19_v44  ;;  %v339_v32 = vld [vmem:[%s3633_s0 + $0x7c0] sm:$0xff]  ;;  %v337_v47 = vld [vmem:[%s3633_s0 + $0x7b0] sm:$0xff] }
  0x59   :  { %642 = vmatpush.bf16.msra.mxu1 %v421_v11  ;;  %v473_v11 = vpack.c.bf16 %v344_v59, %v343_v58  ;;  %v322_v44 = vld [vmem:[%s3633_s0 + $0x738] sm:$0xff] }
  0x5a   :  { %660 = vmatpush.bf16.msra.mxu2 %v429_v55  ;;  %v450_v55 = vpack.c.bf16 %v298_v35, %v297_v34  ;;  %v448_v34 = vpack.c.bf16 %v294_v25, %v293_v24  ;;  %v456_v35 = vpack.c.bf16 %v310_v29, %v309_v28  ;;  %v303_v24 = vld [vmem:[%s3633_s0 + $0x6a0] sm:$0xff]  ;;  %v304_v25 = vld [vmem:[%s3633_s0 + $0x6a8] sm:$0xff]  ;;  %v318_v29 = vld [vmem:[%s3633_s0 + $0x718] sm:$0xff] }
  0x5b   :  { %678 = vmatpush.bf16.msra.mxu3 %v437_v7  ;;  %v465_v7 = vpack.c.bf16 %v328_v42, %v327_v41  ;;  %v307_v41 = vld [vmem:[%s3633_s0 + $0x6c0] sm:$0xff]  ;;  %v308_v42 = vld [vmem:[%s3633_s0 + $0x6c8] sm:$0xff] }
  0x5c   :  { %625 = vmatpush.bf16.msra.mxu0 %v412_v22  ;;  %v449_v22 = vpack.c.bf16 %v296_v10, %v295_v9  ;;  %v455_v52 = vpack.c.bf16 %v308_v42, %v307_v41  ;;  %v336_v9 = vld [vmem:[%s3633_s0 + $0x7a8] sm:$0xff]  ;;  %v51_v10 = vld [vmem:[%s3634_s1 + $0x140] sm:$0xf]  ;;  %v302_v42 = vld [vmem:[%s3633_s0 + $0x698] sm:$0xff] }
  0x5d   :  { %643 = vmatpush.bf16.msra.mxu1 %v420_v26  ;;  %v464_v26 = vpack.c.bf16 %v326_v17, %v325_v14  ;;  %v454_v17 = vpack.c.bf16 %v306_v3, %v305_v0  ;;  %v283_v0 = vld [vmem:[%s3633_s0 + $0x600] sm:$0xff]  ;;  %v284_v3 = vld [vmem:[%s3633_s0 + $0x608] sm:$0xff] }
  0x5e   :  { %661 = vmatpush.bf16.msra.mxu2 %v428_v12  ;;  %v311_v12 = vld [vmem:[%s3633_s0 + $0x6e0] sm:$0xff] }
  0x5f   :  { %679 = vmatpush.bf16.msra.mxu3 %v436_v21  ;;  %v2515_v21 = vpack.c.bf16 %v38_v8, %v22_v4  ;;  %v457_v23 = vpack.c.bf16 %v312_v13, %v311_v12  ;;  %v319_v4 = vld [vmem:[%s3633_s0 + $0x720] sm:$0xff]  ;;  %v53_v12 = vld [vmem:[%s3634_s1 + $0x150] sm:$0xf]  ;;  %v54_v13 = vld [vmem:[%s3634_s1 + $0x158] sm:$0xf] }
  0x60   :  { %626 = vmatpush.bf16.msra.mxu0 %v411_v39  ;;  %v471_v39 = vpack.c.bf16 %v340_v33, %v339_v32  ;;  %v335_v8 = vld [vmem:[%s3633_s0 + $0x7a0] sm:$0xff]  ;;  %v2622_v28 = vpack.c.bf16 %v53_v12, %v53_v12  ;;  %v2635_v33 = vpack.c.bf16 %v54_v13, %v54_v13 }
  0x61   :  { %644 = vmatpush.bf16.msra.mxu1 %v419_v43  ;;  %v321_v43 = vld [vmem:[%s3633_s0 + $0x730] sm:$0xff] }
  0x62   :  { %662 = vmatpush.bf16.msra.mxu2 %v427_v27  ;;  %v472_v27 = vpack.c.bf16 %v342_v19, %v341_v18  ;;  %v462_v58 = vpack.c.bf16 %v322_v44, %v321_v43  ;;  %v287_v18 = vld [vmem:[%s3633_s0 + $0x620] sm:$0xff]  ;;  %v288_v19 = vld [vmem:[%s3633_s0 + $0x628] sm:$0xff] }
  0x63   :  { %680 = vmatpush.bf16.msra.mxu3 %v435_v38  ;;  %627 = vmatmul.bf16.vlgmr.msra.gmra.mxu0 %v2500_v15  ;;  %v315_v43 = vld [vmem:[%s3633_s0 + $0x700] sm:$0xff]  ;;  %v316_v44 = vld [vmem:[%s3633_s0 + $0x708] sm:$0xff] }
  0x64   :  { %691 = vmatpush.bf16.msrb.mxu0 %v450_v55  ;;  %645 = vmatmul.bf16.vlgmr.msra.gmra.mxu1 %v2513_v20  ;;  %v289_v55 = vld [vmem:[%s3633_s0 + $0x630] sm:$0xff] }
  0x65   :  { %709 = vmatpush.bf16.msrb.mxu1 %v458_v56  ;;  %663 = vmatmul.bf16.vlgmr.msra.gmra.mxu2 %v2502_v16  ;;  %v290_v56 = vld [vmem:[%s3633_s0 + $0x638] sm:$0xff] }
  0x66   :  { %727 = vmatpush.bf16.msrb.mxu2 %v466_v31  ;;  %v324_v31 = vld [vmem:[%s3633_s0 + $0x748] sm:$0xff]  ;;  %681 = vmatmul.bf16.vlgmr.msra.gmra.mxu3 %v2515_v21  ;;  %v446_v14 = vpack.c.bf16 %v290_v56, %v289_v55  ;;  %v1517_v55 = vld [vmem:[%s3633_s0 + $0x9f0] sm:$0xff]  ;;  %v1518_v56 = vld [vmem:[%s3633_s0 + $0x9f8] sm:$0xff] }
  0x67   :  { %745 = vmatpush.bf16.msrb.mxu3 %v474_v49  ;;  %v463_v38 = vpack.c.bf16 %v324_v31, %v323_v30  ;;  %v338_v49 = vld [vmem:[%s3633_s0 + $0x7b8] sm:$0xff]  ;;  %v333_v30 = vld [vmem:[%s3633_s0 + $0x790] sm:$0xff]  ;;  %v1059_v13 = vpack.c.bf16 %v1518_v56, %v1517_v55 }
  0x68   :  { %692 = vmatpush.bf16.msrb.mxu0 %v449_v22  ;;  %v470_v59 = vpack.c.bf16 %v338_v49, %v337_v47  ;;  %v334_v31 = vld [vmem:[%s3633_s0 + $0x798] sm:$0xff]  ;;  %v331_v47 = vld [vmem:[%s3633_s0 + $0x780] sm:$0xff]  ;;  %v332_v49 = vld [vmem:[%s3633_s0 + $0x788] sm:$0xff] }
  0x69   :  { %710 = vmatpush.bf16.msrb.mxu1 %v457_v23  ;;  %v469_v23 = vpack.c.bf16 %v336_v9, %v335_v8  ;;  %v468_v41 = vpack.c.bf16 %v334_v31, %v333_v30  ;;  %v467_v8 = vpack.c.bf16 %v332_v49, %v331_v47  ;;  %v300_v9 = vld [vmem:[%s3633_s0 + $0x688] sm:$0xff]  ;;  %v26_v47 = vld [vmem:[%s3634_s1 + $0x78] sm:$0xff] }
  0x6a   :  { %728 = vmatpush.bf16.msrb.mxu2 %v465_v7  ;;  %v320_v7 = vld [vmem:[%s3633_s0 + $0x728] sm:$0xff]  ;;  %v42_v49 = vld [vmem:[%s3634_s1 + $0xf8] sm:$0xff] }
  0x6b   :  { %746 = vmatpush.bf16.msrb.mxu3 %v473_v11  ;;  %v52_v11 = vld [vmem:[%s3634_s1 + $0x148] sm:$0xf]  ;;  %v461_v22 = vpack.c.bf16 %v320_v7, %v319_v4  ;;  %v299_v4 = vld [vmem:[%s3633_s0 + $0x680] sm:$0xff]  ;;  %v459_v7 = vpack.c.bf16 %v316_v44, %v315_v43  ;;  %v25_v43 = vld [vmem:[%s3634_s1 + $0x70] sm:$0xff] }
  0x6c   :  { %693 = vmatpush.bf16.msrb.mxu0 %v448_v34  ;;  %v2633_v32 = vpack.c.bf16 %v52_v11, %v52_v11  ;;  %v445_v34 = vpack.c.bf16 %v288_v19, %v287_v18  ;;  %v1470_v11 = vld [vmem:[%s3633_s0 + $0x878] sm:$0xff]  ;;  %v1499_v18 = vld [vmem:[%s3633_s0 + $0x960] sm:$0xff]  ;;  %v1500_v19 = vld [vmem:[%s3633_s0 + $0x968] sm:$0xff] }
  0x6d   :  { %711 = vmatpush.bf16.msrb.mxu1 %v456_v35  ;;  %v453_v35 = vpack.c.bf16 %v304_v25, %v303_v24  ;;  %v443_v24 = vpack.c.bf16 %v284_v3, %v283_v0  ;;  %v451_v25 = vpack.c.bf16 %v300_v9, %v299_v4  ;;  %v41_v44 = vld [vmem:[%s3634_s1 + $0xf0] sm:$0xff]  ;;  %v1482_v9 = vld [vmem:[%s3633_s0 + $0x8d8] sm:$0xff] }
  0x6e   :  { %729 = vmatpush.bf16.msrb.mxu2 %v464_v26  ;;  %v317_v26 = vld [vmem:[%s3633_s0 + $0x710] sm:$0xff]  ;;  %v2766_v4 = vpack.c.bf16 %v41_v44, %v25_v43  ;;  %v1478_v44 = vld [vmem:[%s3633_s0 + $0x8b8] sm:$0xff] }
  0x6f   :  { %747 = vmatpush.bf16.msrb.mxu3 %v472_v27  ;;  %v2620_v27 = vpack.c.bf16 %v51_v10, %v51_v10  ;;  %v1469_v10 = vld [vmem:[%s3633_s0 + $0x870] sm:$0xff] }
  0x70   :  { %694 = vmatpush.bf16.msrb.mxu0 %v447_v51  ;;  %v1501_v51 = vld [vmem:[%s3633_s0 + $0x970] sm:$0xff]  ;;  %v1035_v30 = vpack.c.bf16 %v1470_v11, %v1469_v10  ;;  %v2779_v11 = vpack.c.bf16 %v42_v49, %v26_v47 }
  0x71   :  { %712 = vmatpush.bf16.msrb.mxu1 %v455_v52  ;;  %v1502_v52 = vld [vmem:[%s3633_s0 + $0x978] sm:$0xff]  ;;  %v1465_v0 = vld [vmem:[%s3633_s0 + $0x850] sm:$0xff] }
  0x72   :  { %730 = vmatpush.bf16.msrb.mxu2 %v463_v38  ;;  %v301_v38 = vld [vmem:[%s3633_s0 + $0x690] sm:$0xff]  ;;  %v1051_v12 = vpack.c.bf16 %v1502_v52, %v1501_v51  ;;  %v1498_v52 = vld [vmem:[%s3633_s0 + $0x958] sm:$0xff] }
  0x73   :  { %748 = vmatpush.bf16.msrb.mxu3 %v471_v39  ;;  %v460_v39 = vpack.c.bf16 %v318_v29, %v317_v26  ;;  %632 = vmatmul.bf16.gmra.mxu0 %v2620_v27  ;;  %v23_v26 = vld [vmem:[%s3634_s1 + $0x60] sm:$0xff]  ;;  %v1497_v51 = vld [vmem:[%s3633_s0 + $0x950] sm:$0xff] }
  0x74   :  { %695 = vmatpush.bf16.msrb.mxu0 %v446_v14  ;;  %650 = vmatmul.bf16.gmra.mxu1 %v2633_v32  ;;  %v1485_v14 = vld [vmem:[%s3633_s0 + $0x8f0] sm:$0xff]  ;;  %v39_v29 = vld [vmem:[%s3634_s1 + $0xe0] sm:$0xff] }
  0x75   :  { %713 = vmatpush.bf16.msrb.mxu1 %v454_v17  ;;  %668 = vmatmul.bf16.gmra.mxu2 %v2622_v28  ;;  %v1486_v17 = vld [vmem:[%s3633_s0 + $0x8f8] sm:$0xff]  ;;  %v2764_v3 = vpack.c.bf16 %v39_v29, %v23_v26  ;;  %v1479_v26 = vld [vmem:[%s3633_s0 + $0x8c0] sm:$0xff]  ;;  %v1480_v29 = vld [vmem:[%s3633_s0 + $0x8c8] sm:$0xff] }
  0x76   :  { %731 = vmatpush.bf16.msrb.mxu2 %v462_v58  ;;  %686 = vmatmul.bf16.gmra.mxu3 %v2635_v33  ;;  %v444_v58 = vpack.c.bf16 %v286_v37, %v285_v36  ;;  %v1043_v31 = vpack.c.bf16 %v1486_v17, %v1485_v14  ;;  %v40_v36 = vld [vmem:[%s3634_s1 + $0xe8] sm:$0xff]  ;;  %v1050_v37 = vpack.c.bf16 %v1500_v19, %v1499_v18  ;;  %v1495_v14 = vld [vmem:[%s3633_s0 + $0x940] sm:$0xff]  ;;  %v1477_v43 = vld [vmem:[%s3633_s0 + $0x8b0] sm:$0xff] }
  0x77   :  { %749 = vmatpush.bf16.msrb.mxu3 %v470_v59  ;;  %v452_v59 = vpack.c.bf16 %v302_v42, %v301_v38  ;;  %v1484_v42 = vld [vmem:[%s3633_s0 + $0x8e8] sm:$0xff] }
  0x78   :  { %696 = vmatpush.bf16.msrb.mxu0 %v445_v34  ;;  %v1467_v34 = vld [vmem:[%s3633_s0 + $0x860] sm:$0xff]  ;;  %v1496_v17 = vld [vmem:[%s3633_s0 + $0x948] sm:$0xff] }
  0x79   :  { %714 = vmatpush.bf16.msrb.mxu1 %v453_v35  ;;  %v24_v35 = vld [vmem:[%s3634_s1 + $0x68] sm:$0xff] }
  0x7a   :  { %732 = vmatpush.bf16.msrb.mxu2 %v461_v22  ;;  %v1515_v22 = vld [vmem:[%s3633_s0 + $0x9e0] sm:$0xff]  ;;  %v2777_v10 = vpack.c.bf16 %v40_v36, %v24_v35  ;;  %v1494_v35 = vld [vmem:[%s3633_s0 + $0x938] sm:$0xff] }
  0x7b   :  { %750 = vmatpush.bf16.msrb.mxu3 %v469_v23  ;;  %v1516_v23 = vld [vmem:[%s3633_s0 + $0x9e8] sm:$0xff] }
  0x7c   :  { %697 = vmatpush.bf16.msrb.mxu0 %v444_v58  ;;  %v1058_v38 = vpack.c.bf16 %v1516_v23, %v1515_v22  ;;  %v1513_v58 = vld [vmem:[%s3633_s0 + $0x9d0] sm:$0xff]  ;;  %v1511_v22 = vld [vmem:[%s3633_s0 + $0x9c0] sm:$0xff]  ;;  %v1512_v23 = vld [vmem:[%s3633_s0 + $0x9c8] sm:$0xff] }
  0x7d   :  { %715 = vmatpush.bf16.msrb.mxu1 %v452_v59  ;;  %v1514_v59 = vld [vmem:[%s3633_s0 + $0x9d8] sm:$0xff] }
  0x7e   :  { %733 = vmatpush.bf16.msrb.mxu2 %v460_v39  ;;  %v1468_v39 = vld [vmem:[%s3633_s0 + $0x868] sm:$0xff] }
  0x7f   :  { %751 = vmatpush.bf16.msrb.mxu3 %v468_v41  ;;  %v1483_v41 = vld [vmem:[%s3633_s0 + $0x8e0] sm:$0xff]  ;;  %v1034_v55 = vpack.c.bf16 %v1468_v39, %v1467_v34  ;;  %v1493_v34 = vld [vmem:[%s3633_s0 + $0x930] sm:$0xff]  ;;  %v1510_v39 = vld [vmem:[%s3633_s0 + $0x9b8] sm:$0xff] }
  0x80   :  { %698 = vmatpush.bf16.msrb.mxu0 %v443_v24  ;;  %v1042_v56 = vpack.c.bf16 %v1484_v42, %v1483_v41  ;;  %v1463_v24 = vld [vmem:[%s3633_s0 + $0x840] sm:$0xff]  ;;  %v1461_v41 = vld [vmem:[%s3633_s0 + $0x830] sm:$0xff]  ;;  %v1462_v42 = vld [vmem:[%s3633_s0 + $0x838] sm:$0xff]  ;;  %v1047_v47 = vpack.c.bf16 %v1494_v35, %v1493_v34 }
  0x81   :  { %716 = vmatpush.bf16.msrb.mxu1 %v451_v25  ;;  %v1464_v25 = vld [vmem:[%s3633_s0 + $0x848] sm:$0xff]  ;;  %v1458_v35 = vld [vmem:[%s3633_s0 + $0x818] sm:$0xff] }
  0x82   :  { %734 = vmatpush.bf16.msrb.mxu2 %v459_v7  ;;  %v1466_v7 = vld [vmem:[%s3633_s0 + $0x858] sm:$0xff]  ;;  %v1032_v36 = vpack.c.bf16 %v1464_v25, %v1463_v24 }
  0x83   :  { %752 = vmatpush.bf16.msrb.mxu3 %v467_v8  ;;  %v1481_v8 = vld [vmem:[%s3633_s0 + $0x8d0] sm:$0xff]  ;;  %v1033_v18 = vpack.c.bf16 %v1466_v7, %v1465_v0  ;;  %699 = vmatmul.bf16.vlgmr.msrb.gmra.mxu0 %v2764_v3  ;;  %v1459_v0 = vld [vmem:[%s3633_s0 + $0x820] sm:$0xff]  ;;  %v1460_v7 = vld [vmem:[%s3633_s0 + $0x828] sm:$0xff] }
  0x84   :  { %1156 = vmatpush.bf16.msra.mxu0 %v1035_v30  ;;  %v1041_v19 = vpack.c.bf16 %v1482_v9, %v1481_v8  ;;  %717 = vmatmul.bf16.vlgmr.msrb.gmra.mxu1 %v2777_v10  ;;  %v1048_v30 = vpack.c.bf16 %v1496_v17, %v1495_v14  ;;  %v1475_v8 = vld [vmem:[%s3633_s0 + $0x8a0] sm:$0xff]  ;;  %v1476_v9 = vld [vmem:[%s3633_s0 + $0x8a8] sm:$0xff]  ;;  %v57_v14 = vld [vmem:[%s3634_s1 + $0x170] sm:$0xf]  ;;  %v1030_v24 = vpack.c.bf16 %v1460_v7, %v1459_v0 }
  0x85   :  { %1174 = vmatpush.bf16.msra.mxu1 %v1043_v31  ;;  %735 = vmatmul.bf16.vlgmr.msrb.gmra.mxu2 %v2766_v4  ;;  %v1056_v31 = vpack.c.bf16 %v1512_v23, %v1511_v22  ;;  %v58_v17 = vld [vmem:[%s3634_s1 + $0x178] sm:$0xf]  ;;  %v1489_v22 = vld [vmem:[%s3633_s0 + $0x910] sm:$0xff]  ;;  %v1038_v25 = vpack.c.bf16 %v1476_v9, %v1475_v8  ;;  %v2886_v34 = vpack.c.bf16 %v57_v14, %v57_v14 }
  0x86   :  { %1192 = vmatpush.bf16.msra.mxu2 %v1051_v12  ;;  %v1049_v12 = vpack.c.bf16 %v1498_v52, %v1497_v51  ;;  %753 = vmatmul.bf16.vlgmr.msrb.gmra.mxu3 %v2779_v11  ;;  %v1491_v51 = vld [vmem:[%s3633_s0 + $0x920] sm:$0xff]  ;;  %v1492_v52 = vld [vmem:[%s3633_s0 + $0x928] sm:$0xff]  ;;  %v1490_v23 = vld [vmem:[%s3633_s0 + $0x918] sm:$0xff] }
  0x87   :  { %1210 = vmatpush.bf16.msra.mxu3 %v1059_v13  ;;  %v1057_v13 = vpack.c.bf16 %v1514_v59, %v1513_v58  ;;  %v1507_v58 = vld [vmem:[%s3633_s0 + $0x9a0] sm:$0xff]  ;;  %v1508_v59 = vld [vmem:[%s3633_s0 + $0x9a8] sm:$0xff]  ;;  %v1565_v0 = vld [vmem:[%s3633_s0 + $0xb70] sm:$0xff] }
  0x88   :  { %1157 = vmatpush.bf16.msra.mxu0 %v1034_v55  ;;  %v1031_v55 = vpack.c.bf16 %v1462_v42, %v1461_v41  ;;  %v1487_v41 = vld [vmem:[%s3633_s0 + $0x900] sm:$0xff]  ;;  %v1045_v42 = vpack.c.bf16 %v1490_v23, %v1489_v22  ;;  %v1566_v7 = vld [vmem:[%s3633_s0 + $0xb78] sm:$0xff]  ;;  %v1581_v8 = vld [vmem:[%s3633_s0 + $0xbf0] sm:$0xff] }
  0x89   :  { %1175 = vmatpush.bf16.msra.mxu1 %v1042_v56  ;;  %v1039_v56 = vpack.c.bf16 %v1478_v44, %v1477_v43  ;;  %v1488_v44 = vld [vmem:[%s3633_s0 + $0x908] sm:$0xff]  ;;  %v1582_v9 = vld [vmem:[%s3633_s0 + $0xbf8] sm:$0xff] }
  0x8a   :  { %1193 = vmatpush.bf16.msra.mxu2 %v1050_v37  ;;  %v1040_v37 = vpack.c.bf16 %v1480_v29, %v1479_v26  ;;  %v1505_v26 = vld [vmem:[%s3633_s0 + $0x990] sm:$0xff]  ;;  %v1506_v29 = vld [vmem:[%s3633_s0 + $0x998] sm:$0xff] }
  0x8b   :  { %1211 = vmatpush.bf16.msra.mxu3 %v1058_v38  ;;  %v1509_v38 = vld [vmem:[%s3633_s0 + $0x9b0] sm:$0xff]  ;;  %v1053_v43 = vpack.c.bf16 %v1506_v29, %v1505_v26  ;;  %v1563_v26 = vld [vmem:[%s3633_s0 + $0xb60] sm:$0xff]  ;;  %v1564_v29 = vld [vmem:[%s3633_s0 + $0xb68] sm:$0xff] }
  0x8c   :  { %1158 = vmatpush.bf16.msra.mxu0 %v1033_v18  ;;  %v1055_v49 = vpack.c.bf16 %v1510_v39, %v1509_v38  ;;  %v1046_v18 = vpack.c.bf16 %v1492_v52, %v1491_v51  ;;  %v2899_v39 = vpack.c.bf16 %v58_v17, %v58_v17  ;;  %v1534_v17 = vld [vmem:[%s3633_s0 + $0xa78] sm:$0xff] }
  0x8d   :  { %1176 = vmatpush.bf16.msra.mxu1 %v1041_v19  ;;  %v1054_v19 = vpack.c.bf16 %v1508_v59, %v1507_v58  ;;  %v1471_v58 = vld [vmem:[%s3633_s0 + $0x880] sm:$0xff]  ;;  %v1472_v59 = vld [vmem:[%s3633_s0 + $0x888] sm:$0xff] }
  0x8e   :  { %1194 = vmatpush.bf16.msra.mxu2 %v1049_v12  ;;  %v55_v12 = vld [vmem:[%s3634_s1 + $0x160] sm:$0xf]  ;;  %v1036_v23 = vpack.c.bf16 %v1472_v59, %v1471_v58  ;;  %v1577_v58 = vld [vmem:[%s3633_s0 + $0xbd0] sm:$0xff]  ;;  %v1578_v59 = vld [vmem:[%s3633_s0 + $0xbd8] sm:$0xff] }
  0x8f   :  { %1212 = vmatpush.bf16.msra.mxu3 %v1057_v13  ;;  %v56_v13 = vld [vmem:[%s3634_s1 + $0x168] sm:$0xf] }
  0x90   :  { %1159 = vmatpush.bf16.msra.mxu0 %v1032_v36  ;;  %v1473_v36 = vld [vmem:[%s3633_s0 + $0x890] sm:$0xff]  ;;  %v2897_v38 = vpack.c.bf16 %v56_v13, %v56_v13  ;;  %v1044_v13 = vpack.c.bf16 %v1488_v44, %v1487_v41  ;;  %v1531_v41 = vld [vmem:[%s3633_s0 + $0xa60] sm:$0xff]  ;;  %v1548_v44 = vld [vmem:[%s3633_s0 + $0xae8] sm:$0xff] }
  0x91   :  { %1177 = vmatpush.bf16.msra.mxu1 %v1040_v37  ;;  %v1474_v37 = vld [vmem:[%s3633_s0 + $0x898] sm:$0xff] }
  0x92   :  { %1195 = vmatpush.bf16.msra.mxu2 %v1048_v30  ;;  %v1457_v30 = vld [vmem:[%s3633_s0 + $0x810] sm:$0xff]  ;;  %v1037_v52 = vpack.c.bf16 %v1474_v37, %v1473_v36  ;;  %v1579_v36 = vld [vmem:[%s3633_s0 + $0xbe0] sm:$0xff]  ;;  %v1580_v37 = vld [vmem:[%s3633_s0 + $0xbe8] sm:$0xff] }
  0x93   :  { %1213 = vmatpush.bf16.msra.mxu3 %v1056_v31  ;;  %v2884_v31 = vpack.c.bf16 %v55_v12, %v55_v12  ;;  %v1029_v51 = vpack.c.bf16 %v1458_v35, %v1457_v30  ;;  %v1533_v12 = vld [vmem:[%s3633_s0 + $0xa70] sm:$0xff] }
  0x94   :  { %1160 = vmatpush.bf16.msra.mxu0 %v1031_v55  ;;  %v1455_v55 = vld [vmem:[%s3633_s0 + $0x800] sm:$0xff]  ;;  %722 = vmatmul.bf16.gmra.mxu1 %v2897_v38  ;;  %v1067_v30 = vpack.c.bf16 %v1534_v17, %v1533_v12  ;;  %v1546_v12 = vld [vmem:[%s3633_s0 + $0xad8] sm:$0xff] }
  0x95   :  { %1178 = vmatpush.bf16.msra.mxu1 %v1039_v56  ;;  %v1456_v56 = vld [vmem:[%s3633_s0 + $0x808] sm:$0xff]  ;;  %704 = vmatmul.bf16.gmra.mxu0 %v2884_v31 }
  0x96   :  { %1196 = vmatpush.bf16.msra.mxu2 %v1047_v47  ;;  %v1503_v47 = vld [vmem:[%s3633_s0 + $0x980] sm:$0xff]  ;;  %758 = vmatmul.bf16.gmra.mxu3 %v2899_v39  ;;  %v1028_v22 = vpack.c.bf16 %v1456_v56, %v1455_v55  ;;  %v1561_v55 = vld [vmem:[%s3633_s0 + $0xb50] sm:$0xff]  ;;  %v1562_v56 = vld [vmem:[%s3633_s0 + $0xb58] sm:$0xff] }
  0x97   :  { %1214 = vmatpush.bf16.msra.mxu3 %v1055_v49  ;;  %v1504_v49 = vld [vmem:[%s3633_s0 + $0x988] sm:$0xff]  ;;  %740 = vmatmul.bf16.gmra.mxu2 %v2886_v34  ;;  %v1081_v17 = vpack.c.bf16 %v1562_v56, %v1561_v55  ;;  %v1526_v55 = vld [vmem:[%s3633_s0 + $0xa38] sm:$0xff]  ;;  %v1541_v56 = vld [vmem:[%s3633_s0 + $0xab0] sm:$0xff] }
  0x98   :  { %1161 = vmatpush.bf16.msra.mxu0 %v1030_v24  ;;  %v1052_v14 = vpack.c.bf16 %v1504_v49, %v1503_v47  ;;  %v1083_v24 = vpack.c.bf16 %v1566_v7, %v1565_v0  ;;  %v1082_v47 = vpack.c.bf16 %v1564_v29, %v1563_v26  ;;  %v1090_v49 = vpack.c.bf16 %v1580_v37, %v1579_v36  ;;  %v1529_v0 = vld [vmem:[%s3633_s0 + $0xa50] sm:$0xff]  ;;  %v1576_v26 = vld [vmem:[%s3633_s0 + $0xbc8] sm:$0xff]  ;;  %v1527_v29 = vld [vmem:[%s3633_s0 + $0xa40] sm:$0xff] }
  0x99   :  { %1179 = vmatpush.bf16.msra.mxu1 %v1038_v25  ;;  %v1091_v25 = vpack.c.bf16 %v1582_v9, %v1581_v8  ;;  %v1530_v8 = vld [vmem:[%s3633_s0 + $0xa58] sm:$0xff]  ;;  %v1545_v9 = vld [vmem:[%s3633_s0 + $0xad0] sm:$0xff]  ;;  %v1544_v36 = vld [vmem:[%s3633_s0 + $0xac8] sm:$0xff] }
  0x9a   :  { %1197 = vmatpush.bf16.msra.mxu2 %v1046_v18  ;;  %v1549_v18 = vld [vmem:[%s3633_s0 + $0xaf0] sm:$0xff] }
  0x9b   :  { %1215 = vmatpush.bf16.msra.mxu3 %v1054_v19  ;;  %v1550_v19 = vld [vmem:[%s3633_s0 + $0xaf8] sm:$0xff]  ;;  %v1557_v37 = vld [vmem:[%s3633_s0 + $0xb30] sm:$0xff] }
  0x9c   :  { %1162 = vmatpush.bf16.msra.mxu0 %v1029_v51  ;;  %v1075_v35 = vpack.c.bf16 %v1550_v19, %v1549_v18  ;;  %v1089_v18 = vpack.c.bf16 %v1578_v59, %v1577_v58  ;;  %v1559_v19 = vld [vmem:[%s3633_s0 + $0xb40] sm:$0xff]  ;;  %v1542_v58 = vld [vmem:[%s3633_s0 + $0xab8] sm:$0xff] }
  0x9d   :  { %1180 = vmatpush.bf16.msra.mxu1 %v1037_v52 }
  0x9e   :  { %1198 = vmatpush.bf16.msra.mxu2 %v1045_v42  ;;  %v1532_v42 = vld [vmem:[%s3633_s0 + $0xa68] sm:$0xff] }
  0x9f   :  { %1216 = vmatpush.bf16.msra.mxu3 %v1053_v43  ;;  %v1547_v43 = vld [vmem:[%s3633_s0 + $0xae0] sm:$0xff]  ;;  %v1066_v51 = vpack.c.bf16 %v1532_v42, %v1531_v41  ;;  %v1558_v41 = vld [vmem:[%s3633_s0 + $0xb38] sm:$0xff] }
  0xa0   :  { %1163 = vmatpush.bf16.msra.mxu0 %v1028_v22  ;;  %v1074_v52 = vpack.c.bf16 %v1548_v44, %v1547_v43  ;;  %v484_v7 = vpop.f32.mrf.mxu0  ;;  %v1560_v22 = vld [vmem:[%s3633_s0 + $0xb48] sm:$0xff] }
  0xa1   :  { %1181 = vmatpush.bf16.msra.mxu1 %v1036_v23  ;;  %v1065_v23 = vpack.c.bf16 %v1530_v8, %v1529_v0  ;;  %v1079_v0 = vpack.c.bf16 %v1558_v41, %v1557_v37  ;;  %v1569_v37 = vld [vmem:[%s3633_s0 + $0xb90] sm:$0xff]  ;;  %v1570_v41 = vld [vmem:[%s3633_s0 + $0xb98] sm:$0xff] }
  0xa2   :  { %1199 = vmatpush.bf16.msra.mxu2 %v1044_v13  ;;  %v502_v13 = vpop.f32.mrf.mxu1 }
  0xa3   :  { %1217 = vmatpush.bf16.msra.mxu3 %v1052_v14  ;;  %v503_v14 = vadd.f32 %v502_v13, %v484_v7  ;;  %v1556_v13 = vld [vmem:[%s3633_s0 + $0xb28] sm:$0xff] }
  0xa4   :  { %1228 = vmatpush.bf16.msrb.mxu0 %v1067_v30  ;;  %v1528_v30 = vld [vmem:[%s3633_s0 + $0xa48] sm:$0xff]  ;;  %1182 = vmatmul.bf16.vlgmr.msra.gmra.mxu1 %v1977_v53  ;;  %v1573_v53 = vld [vmem:[%s3633_s0 + $0xbb0] sm:$0xff] }
  0xa5   :  { %1246 = vmatpush.bf16.msrb.mxu1 %v1075_v35  ;;  %1164 = vmatmul.bf16.vlgmr.msra.gmra.mxu0 %v1966_v48  ;;  %v1543_v35 = vld [vmem:[%s3633_s0 + $0xac0] sm:$0xff]  ;;  %v1080_v48 = vpack.c.bf16 %v1560_v22, %v1559_v19  ;;  %v1064_v43 = vpack.c.bf16 %v1528_v30, %v1527_v29  ;;  %v1572_v19 = vld [vmem:[%s3633_s0 + $0xba8] sm:$0xff]  ;;  %v1553_v30 = vld [vmem:[%s3633_s0 + $0xb10] sm:$0xff] }
  0xa6   :  { %1264 = vmatpush.bf16.msrb.mxu2 %v1083_v24  ;;  %v1073_v24 = vpack.c.bf16 %v1546_v12, %v1545_v9  ;;  %1218 = vmatmul.bf16.vlgmr.msra.gmra.mxu3 %v1987_v57  ;;  %v1072_v44 = vpack.c.bf16 %v1544_v36, %v1543_v35  ;;  %v1574_v57 = vld [vmem:[%s3633_s0 + $0xbb8] sm:$0xff]  ;;  %v1555_v12 = vld [vmem:[%s3633_s0 + $0xb20] sm:$0xff] }
  0xa7   :  { %1282 = vmatpush.bf16.msrb.mxu3 %v1091_v25  ;;  %v1575_v25 = vld [vmem:[%s3633_s0 + $0xbc0] sm:$0xff]  ;;  %1200 = vmatmul.bf16.vlgmr.msra.gmra.mxu2 %v1979_v54  ;;  %v1087_v9 = vpack.c.bf16 %v1574_v57, %v1573_v53  ;;  %v1554_v35 = vld [vmem:[%s3633_s0 + $0xb18] sm:$0xff] }
  0xa8   :  { %1229 = vmatpush.bf16.msrb.mxu0 %v1066_v51  ;;  %v1088_v54 = vpack.c.bf16 %v1576_v26, %v1575_v25  ;;  %v520_v42 = vpop.f32.mrf.mxu2  ;;  %v1523_v22 = vld [vmem:[%s3633_s0 + $0xa20] sm:$0xff]  ;;  %v1540_v25 = vld [vmem:[%s3633_s0 + $0xaa8] sm:$0xff]  ;;  %v1078_v26 = vpack.c.bf16 %v1556_v13, %v1555_v12  ;;  %v1522_v57 = vld [vmem:[%s3633_s0 + $0xa18] sm:$0xff] }
  0xa9   :  { %1247 = vmatpush.bf16.msrb.mxu1 %v1074_v52  ;;  %v538_v51 = vpop.f32.mrf.mxu3  ;;  %v486_v52 = vpop.f32.mrf.mxu0 }
  0xaa   :  { %1265 = vmatpush.bf16.msrb.mxu2 %v1082_v47  ;;  %v1525_v47 = vld [vmem:[%s3633_s0 + $0xa30] sm:$0xff]  ;;  %v504_v59 = vpop.f32.mrf.mxu1 }
  0xab   :  { %1283 = vmatpush.bf16.msrb.mxu3 %v1090_v49  ;;  %v521_v49 = vadd.f32 %v520_v42, %v503_v14  ;;  %v505_v8 = vadd.f32 %v504_v59, %v486_v52  ;;  %v1063_v14 = vpack.c.bf16 %v1526_v55, %v1525_v47  ;;  %v1521_v42 = vld [vmem:[%s3633_s0 + $0xa10] sm:$0xff]  ;;  %v1077_v52 = vpack.c.bf16 %v1554_v35, %v1553_v30  ;;  %v1551_v55 = vld [vmem:[%s3633_s0 + $0xb00] sm:$0xff] }
  0xac   :  { %1230 = vmatpush.bf16.msrb.mxu0 %v1065_v23  ;;  %v1524_v23 = vld [vmem:[%s3633_s0 + $0xa28] sm:$0xff]  ;;  %v1537_v47 = vld [vmem:[%s3633_s0 + $0xa90] sm:$0xff]  ;;  %v1085_v59 = vpack.c.bf16 %v1570_v41, %v1569_v37  ;;  %v1061_v12 = vpack.c.bf16 %v1522_v57, %v1521_v42 }
  0xad   :  { %1248 = vmatpush.bf16.msrb.mxu1 %v1073_v24  ;;  %v3053_v7 = vadd.f32 %v538_v51, %v521_v49  ;;  %v1539_v24 = vld [vmem:[%s3633_s0 + $0xaa0] sm:$0xff]  ;;  %v1538_v49 = vld [vmem:[%s3633_s0 + $0xa98] sm:$0xff] }
  0xae   :  { %1266 = vmatpush.bf16.msrb.mxu2 %v1081_v17  ;;  %v1071_v17 = vpack.c.bf16 %v1542_v58, %v1541_v56  ;;  %v1069_v13 = vpack.c.bf16 %v1538_v49, %v1537_v47  ;;  %v1643_v49 = vld [vmem:[%s3633_s0 + $0xde0] sm:$0xff] }
  0xaf   :  { %1284 = vmatpush.bf16.msrb.mxu3 %v1089_v18  ;;  %v1571_v18 = vld [vmem:[%s3633_s0 + $0xba0] sm:$0xff] }
  0xb0   :  { %1231 = vmatpush.bf16.msrb.mxu0 %v1064_v43  ;;  %v1086_v29 = vpack.c.bf16 %v1572_v19, %v1571_v18  ;;  %v522_v36 = vpop.f32.mrf.mxu2  ;;  %v1535_v18 = vld [vmem:[%s3633_s0 + $0xa80] sm:$0xff]  ;;  %v1536_v19 = vld [vmem:[%s3633_s0 + $0xa88] sm:$0xff] }
  0xb1   :  { %1249 = vmatpush.bf16.msrb.mxu1 %v1072_v44  ;;  %v523_v43 = vadd.f32 %v522_v36, %v505_v8  ;;  %v540_v44 = vpop.f32.mrf.mxu3  ;;  %v489_v53 = vpop.f32.mrf.mxu0  ;;  %v1567_v8 = vld [vmem:[%s3633_s0 + $0xb80] sm:$0xff]  ;;  %v1068_v36 = vpack.c.bf16 %v1536_v19, %v1535_v18  ;;  %v1641_v19 = vld [vmem:[%s3633_s0 + $0xdd0] sm:$0xff] }
  0xb2   :  { %1267 = vmatpush.bf16.msrb.mxu2 %v1080_v48  ;;  %v1062_v48 = vpack.c.bf16 %v1524_v23, %v1523_v22  ;;  %v507_v51 = vpop.f32.mrf.mxu1  ;;  %v1629_v22 = vld [vmem:[%s3633_s0 + $0xd70] sm:$0xff]  ;;  %v1630_v23 = vld [vmem:[%s3633_s0 + $0xd78] sm:$0xff] }
  0xb3   :  { %1285 = vmatpush.bf16.msrb.mxu3 %v1088_v54  ;;  %v1070_v54 = vpack.c.bf16 %v1540_v25, %v1539_v24  ;;  %v3106_v56 = vadd.f32 %v540_v44, %v523_v43  ;;  %v508_v58 = vadd.f32 %v507_v51, %v489_v53  ;;  %v1597_v24 = vld [vmem:[%s3633_s0 + $0xc70] sm:$0xff]  ;;  %v1115_v41 = vpack.c.bf16 %v1630_v23, %v1629_v22  ;;  %v1627_v43 = vld [vmem:[%s3633_s0 + $0xd60] sm:$0xff]  ;;  %v1628_v44 = vld [vmem:[%s3633_s0 + $0xd68] sm:$0xff] }
  0xb4   :  { %1232 = vmatpush.bf16.msrb.mxu0 %v1063_v14  ;;  %v1519_v14 = vld [vmem:[%s3633_s0 + $0xa00] sm:$0xff]  ;;  %1187 = vmatmul.bf16.gmra.mxu1 %v2097_v45  ;;  %v1598_v45 = vld [vmem:[%s3633_s0 + $0xc78] sm:$0xff]  ;;  %v1644_v51 = vld [vmem:[%s3633_s0 + $0xde8] sm:$0xff] }
  0xb5   :  { %1250 = vmatpush.bf16.msrb.mxu1 %v1071_v17  ;;  %v1520_v17 = vld [vmem:[%s3633_s0 + $0xa08] sm:$0xff]  ;;  %1169 = vmatmul.bf16.gmra.mxu0 %v2086_v40  ;;  %v1645_v40 = vld [vmem:[%s3633_s0 + $0xdf0] sm:$0xff]  ;;  %v1099_v57 = vpack.c.bf16 %v1598_v45, %v1597_v24  ;;  %v1642_v22 = vld [vmem:[%s3633_s0 + $0xdd8] sm:$0xff] }
  0xb6   :  { %1268 = vmatpush.bf16.msrb.mxu2 %v1079_v0  ;;  %v1552_v0 = vld [vmem:[%s3633_s0 + $0xb08] sm:$0xff]  ;;  %1223 = vmatmul.bf16.gmra.mxu3 %v2107_v50  ;;  %v1613_v50 = vld [vmem:[%s3633_s0 + $0xcf0] sm:$0xff]  ;;  %v1060_v35 = vpack.c.bf16 %v1520_v17, %v1519_v14  ;;  %v1626_v17 = vld [vmem:[%s3633_s0 + $0xd58] sm:$0xff] }
  0xb7   :  { %1286 = vmatpush.bf16.msrb.mxu3 %v1087_v9  ;;  %v1568_v9 = vld [vmem:[%s3633_s0 + $0xb88] sm:$0xff]  ;;  %1205 = vmatmul.bf16.gmra.mxu2 %v2099_v46  ;;  %v1646_v46 = vld [vmem:[%s3633_s0 + $0xdf8] sm:$0xff]  ;;  %v1076_v25 = vpack.c.bf16 %v1552_v0, %v1551_v55  ;;  %v1625_v14 = vld [vmem:[%s3633_s0 + $0xd50] sm:$0xff] }
  0xb8   :  { %1233 = vmatpush.bf16.msrb.mxu0 %v1062_v48  ;;  %v525_v30 = vpop.f32.mrf.mxu2  ;;  %v1123_v42 = vpack.c.bf16 %v1646_v46, %v1645_v40  ;;  %v1612_v0 = vld [vmem:[%s3633_s0 + $0xce8] sm:$0xff]  ;;  %v1593_v23 = vld [vmem:[%s3633_s0 + $0xc50] sm:$0xff]  ;;  %v1594_v46 = vld [vmem:[%s3633_s0 + $0xc58] sm:$0xff] }
  0xb9   :  { %1251 = vmatpush.bf16.msrb.mxu1 %v1070_v54  ;;  %v526_v48 = vadd.f32 %v525_v30, %v508_v58  ;;  %v543_v54 = vpop.f32.mrf.mxu3  ;;  %v491_v37 = vpop.f32.mrf.mxu0  ;;  %v1596_v58 = vld [vmem:[%s3633_s0 + $0xc68] sm:$0xff]  ;;  %v1609_v24 = vld [vmem:[%s3633_s0 + $0xcd0] sm:$0xff]  ;;  %v1623_v30 = vld [vmem:[%s3633_s0 + $0xd40] sm:$0xff] }
  0xba   :  { %1269 = vmatpush.bf16.msrb.mxu2 %v1078_v26  ;;  %v1084_v26 = vpack.c.bf16 %v1568_v9, %v1567_v8  ;;  %v509_v53 = vpop.f32.mrf.mxu1  ;;  %v1114_v8 = vpack.c.bf16 %v1628_v44, %v1627_v43  ;;  %v1122_v9 = vpack.c.bf16 %v1644_v51, %v1643_v49  ;;  %v1640_v37 = vld [vmem:[%s3633_s0 + $0xdc8] sm:$0xff]  ;;  %v1607_v43 = vld [vmem:[%s3633_s0 + $0xcc0] sm:$0xff]  ;;  %v1638_v51 = vld [vmem:[%s3633_s0 + $0xdb8] sm:$0xff] }
  0xbb   :  { %1287 = vmatpush.bf16.msrb.mxu3 %v1086_v29  ;;  %v1614_v29 = vld [vmem:[%s3633_s0 + $0xcf8] sm:$0xff]  ;;  %v3172_v55 = vadd.f32 %v543_v54, %v526_v48  ;;  %v1639_v54 = vld [vmem:[%s3633_s0 + $0xdc0] sm:$0xff]  ;;  %v1608_v44 = vld [vmem:[%s3633_s0 + $0xcc8] sm:$0xff] }
  0xbc   :  { %1234 = vmatpush.bf16.msrb.mxu0 %v1061_v12  ;;  %v1107_v47 = vpack.c.bf16 %v1614_v29, %v1613_v50  ;;  %v1113_v50 = vpack.c.bf16 %v1626_v17, %v1625_v14  ;;  %v1121_v29 = vpack.c.bf16 %v1642_v22, %v1641_v19  ;;  %v1621_v53 = vld [vmem:[%s3633_s0 + $0xd30] sm:$0xff]  ;;  %v1619_v17 = vld [vmem:[%s3633_s0 + $0xd20] sm:$0xff] }
  0xbd   :  { %1252 = vmatpush.bf16.msrb.mxu1 %v1069_v13 }
  0xbe   :  { %1270 = vmatpush.bf16.msrb.mxu2 %v1077_v52  ;;  %v1595_v52 = vld [vmem:[%s3633_s0 + $0xc60] sm:$0xff] }
  0xbf   :  { %1288 = vmatpush.bf16.msrb.mxu3 %v1085_v59  ;;  %v1611_v59 = vld [vmem:[%s3633_s0 + $0xce0] sm:$0xff]  ;;  %v1098_v12 = vpack.c.bf16 %v1596_v58, %v1595_v52  ;;  %v1589_v52 = vld [vmem:[%s3633_s0 + $0xc30] sm:$0xff] }
  0xc0   :  { %1235 = vmatpush.bf16.msrb.mxu0 %v1060_v35  ;;  %v1106_v13 = vpack.c.bf16 %v1612_v0, %v1611_v59  ;;  %v527_v18 = vpop.f32.mrf.mxu2  ;;  %v1624_v35 = vld [vmem:[%s3633_s0 + $0xd48] sm:$0xff]  ;;  %v1590_v59 = vld [vmem:[%s3633_s0 + $0xc38] sm:$0xff]  ;;  %v1605_v0 = vld [vmem:[%s3633_s0 + $0xcb0] sm:$0xff] }
  0xc1   :  { %1253 = vmatpush.bf16.msrb.mxu1 %v1068_v36  ;;  %v545_v40 = vpop.f32.mrf.mxu3  ;;  %v1097_v36 = vpack.c.bf16 %v1594_v46, %v1593_v23  ;;  %v1620_v18 = vld [vmem:[%s3633_s0 + $0xd28] sm:$0xff]  ;;  %v1095_v19 = vpack.c.bf16 %v1590_v59, %v1589_v52  ;;  %v1635_v23 = vld [vmem:[%s3633_s0 + $0xda0] sm:$0xff] }
  0xc2   :  { %1271 = vmatpush.bf16.msrb.mxu2 %v1076_v25  ;;  %v1610_v25 = vld [vmem:[%s3633_s0 + $0xcd8] sm:$0xff]  ;;  %v3209_v45 = vpop.f32.mrf.mxu1  ;;  %v1636_v40 = vld [vmem:[%s3633_s0 + $0xda8] sm:$0xff]  ;;  %v1587_v46 = vld [vmem:[%s3633_s0 + $0xc20] sm:$0xff] }
  0xc3   :  { %1289 = vmatpush.bf16.msrb.mxu3 %v1084_v26  ;;  %v3207_v26 = vpop.f32.mrf.mxu0  ;;  %v1105_v48 = vpack.c.bf16 %v1610_v25, %v1609_v24  ;;  %v1588_v24 = vld [vmem:[%s3633_s0 + $0xc28] sm:$0xff]  ;;  %v1603_v25 = vld [vmem:[%s3633_s0 + $0xca0] sm:$0xff] }
  0xc4   :  { %1300 = vmatpush.bf16.msra.mxu0 %v1099_v57  ;;  %1254 = vmatmul.bf16.vlgmr.msrb.gmra.mxu1 %v2255_v1  ;;  %v1622_v57 = vld [vmem:[%s3633_s0 + $0xd38] sm:$0xff]  ;;  %v1104_v1 = vpack.c.bf16 %v1608_v44, %v1607_v43  ;;  %v1585_v43 = vld [vmem:[%s3633_s0 + $0xc10] sm:$0xff]  ;;  %v1616_v52 = vld [vmem:[%s3633_s0 + $0xd08] sm:$0xff] }
  0xc5   :  { %1318 = vmatpush.bf16.msra.mxu1 %v1107_v47  ;;  %1236 = vmatmul.bf16.vlgmr.msrb.gmra.mxu0 %v2242_v60  ;;  %v1112_v60 = vpack.c.bf16 %v1624_v35, %v1623_v30  ;;  %v1118_v30 = vpack.c.bf16 %v1636_v40, %v1635_v23  ;;  %v1617_v35 = vld [vmem:[%s3633_s0 + $0xd10] sm:$0xff]  ;;  %v1631_v59 = vld [vmem:[%s3633_s0 + $0xd80] sm:$0xff]  ;;  %v1694_v23 = vld [vmem:[%s3633_s0 + $0xf78] sm:$0xff] }
  0xc6   :  { %1336 = vmatpush.bf16.msra.mxu2 %v1115_v41  ;;  %v1591_v41 = vld [vmem:[%s3633_s0 + $0xc40] sm:$0xff]  ;;  %1290 = vmatmul.bf16.vlgmr.msrb.gmra.mxu3 %v2257_v2  ;;  %v1637_v2 = vld [vmem:[%s3633_s0 + $0xdb0] sm:$0xff] }
  0xc7   :  { %1354 = vmatpush.bf16.msra.mxu3 %v1123_v42  ;;  %1272 = vmatmul.bf16.vlgmr.msrb.gmra.mxu2 %v2244_v61  ;;  %v1592_v42 = vld [vmem:[%s3633_s0 + $0xc48] sm:$0xff]  ;;  %v1120_v61 = vpack.c.bf16 %v1640_v37, %v1639_v54  ;;  %v1119_v14 = vpack.c.bf16 %v1638_v51, %v1637_v2  ;;  %v1094_v54 = vpack.c.bf16 %v1588_v24, %v1587_v46  ;;  %v1661_v40 = vld [vmem:[%s3633_s0 + $0xe70] sm:$0xff] }
  0xc8   :  { %1301 = vmatpush.bf16.msra.mxu0 %v1098_v12  ;;  %v3245_v47 = vpop.f32.mrf.mxu2  ;;  %v1096_v49 = vpack.c.bf16 %v1592_v42, %v1591_v41  ;;  %v1633_v41 = vld [vmem:[%s3633_s0 + $0xd90] sm:$0xff]  ;;  %v1634_v42 = vld [vmem:[%s3633_s0 + $0xd98] sm:$0xff] }
  0xc9   :  { %1319 = vmatpush.bf16.msra.mxu1 %v1106_v13  ;;  %v3256_v58 = vpop.f32.mrf.mxu3  ;;  %v1111_v13 = vpack.c.bf16 %v1622_v57, %v1621_v53  ;;  %v1602_v53 = vld [vmem:[%s3633_s0 + $0xc98] sm:$0xff]  ;;  %v1117_v51 = vpack.c.bf16 %v1634_v42, %v1633_v41  ;;  %v1692_v41 = vld [vmem:[%s3633_s0 + $0xf68] sm:$0xff] }
  0xca   :  { %1337 = vmatpush.bf16.msra.mxu2 %v1114_v8  ;;  %v1606_v8 = vld [vmem:[%s3633_s0 + $0xcb8] sm:$0xff]  ;;  %v3269_v12 = vpop.f32.mrf.mxu1 }
  0xcb   :  { %1355 = vmatpush.bf16.msra.mxu3 %v1122_v9  ;;  %v3267_v9 = vpop.f32.mrf.mxu0  ;;  %v1103_v22 = vpack.c.bf16 %v1606_v8, %v1605_v0  ;;  %v1632_v0 = vld [vmem:[%s3633_s0 + $0xd88] sm:$0xff] }
  0xcc   :  { %1302 = vmatpush.bf16.msra.mxu0 %v1097_v36  ;;  %v1618_v36 = vld [vmem:[%s3633_s0 + $0xd18] sm:$0xff]  ;;  %v1116_v24 = vpack.c.bf16 %v1632_v0, %v1631_v59  ;;  %v1676_v59 = vld [vmem:[%s3633_s0 + $0xee8] sm:$0xff] }
  0xcd   :  { %1320 = vmatpush.bf16.msra.mxu1 %v1105_v48  ;;  %v1109_v2 = vpack.c.bf16 %v1618_v36, %v1617_v35 }
  0xce   :  { %1338 = vmatpush.bf16.msra.mxu2 %v1113_v50  ;;  %v1604_v50 = vld [vmem:[%s3633_s0 + $0xca8] sm:$0xff] }
  0xcf   :  { %1356 = vmatpush.bf16.msra.mxu3 %v1121_v29  ;;  %v1110_v29 = vpack.c.bf16 %v1620_v18, %v1619_v17  ;;  %v1102_v37 = vpack.c.bf16 %v1604_v50, %v1603_v25  ;;  %v1584_v17 = vld [vmem:[%s3633_s0 + $0xc08] sm:$0xff]  ;;  %v1599_v18 = vld [vmem:[%s3633_s0 + $0xc80] sm:$0xff]  ;;  %v1678_v25 = vld [vmem:[%s3633_s0 + $0xef8] sm:$0xff] }
  0xd0   :  { %1303 = vmatpush.bf16.msra.mxu0 %v1096_v49  ;;  %v3301_v48 = vpop.f32.mrf.mxu2  ;;  %v1615_v49 = vld [vmem:[%s3633_s0 + $0xd00] sm:$0xff] }
  0xd1   :  { %1321 = vmatpush.bf16.msra.mxu1 %v1104_v1  ;;  %v3312_v44 = vpop.f32.mrf.mxu3  ;;  %v1108_v46 = vpack.c.bf16 %v1616_v52, %v1615_v49  ;;  %v1659_v49 = vld [vmem:[%s3633_s0 + $0xe60] sm:$0xff] }
  0xd2   :  { %1339 = vmatpush.bf16.msra.mxu2 %v1112_v60  ;;  %v1586_v60 = vld [vmem:[%s3633_s0 + $0xc18] sm:$0xff]  ;;  %v3328_v1 = vpop.f32.mrf.mxu1  ;;  %v1675_v52 = vld [vmem:[%s3633_s0 + $0xee0] sm:$0xff] }
  0xd3   :  { %1357 = vmatpush.bf16.msra.mxu3 %v1120_v61  ;;  %v1601_v61 = vld [vmem:[%s3633_s0 + $0xc90] sm:$0xff]  ;;  %v3323_v57 = vpop.f32.mrf.mxu0  ;;  %v1093_v8 = vpack.c.bf16 %v1586_v60, %v1585_v43 }
  0xd4   :  { %1304 = vmatpush.bf16.msra.mxu0 %v1095_v19  ;;  %v1600_v19 = vld [vmem:[%s3633_s0 + $0xc88] sm:$0xff]  ;;  %1259 = vmatmul.bf16.gmra.mxu1 %v2375_v5  ;;  %v1662_v5 = vld [vmem:[%s3633_s0 + $0xe78] sm:$0xff] }
  0xd5   :  { %1322 = vmatpush.bf16.msra.mxu1 %v1103_v22  ;;  %1241 = vmatmul.bf16.gmra.mxu0 %v2362_v62  ;;  %v1693_v22 = vld [vmem:[%s3633_s0 + $0xf70] sm:$0xff]  ;;  %v1131_v43 = vpack.c.bf16 %v1662_v5, %v1661_v40  ;;  %v1658_v40 = vld [vmem:[%s3633_s0 + $0xe58] sm:$0xff] }
  0xd6   :  { %1340 = vmatpush.bf16.msra.mxu2 %v1111_v13  ;;  %v1101_v13 = vpack.c.bf16 %v1602_v53, %v1601_v61  ;;  %1295 = vmatmul.bf16.gmra.mxu3 %v2377_v6  ;;  %v1709_v62 = vld [vmem:[%s3633_s0 + $0xff0] sm:$0xff]  ;;  %v1147_v36 = vpack.c.bf16 %v1694_v23, %v1693_v22  ;;  %v1707_v61 = vld [vmem:[%s3633_s0 + $0xfe0] sm:$0xff]  ;;  %v1708_v53 = vld [vmem:[%s3633_s0 + $0xfe8] sm:$0xff] }
  0xd7   :  { %1358 = vmatpush.bf16.msra.mxu3 %v1119_v14  ;;  %v1583_v14 = vld [vmem:[%s3633_s0 + $0xc00] sm:$0xff]  ;;  %1277 = vmatmul.bf16.gmra.mxu2 %v2364_v63  ;;  %v1710_v63 = vld [vmem:[%s3633_s0 + $0xff8] sm:$0xff]  ;;  %v1677_v6 = vld [vmem:[%s3633_s0 + $0xef0] sm:$0xff] }
  0xd8   :  { %1305 = vmatpush.bf16.msra.mxu0 %v1094_v54  ;;  %v3379_v50 = vpop.f32.mrf.mxu2  ;;  %v1155_v54 = vpack.c.bf16 %v1710_v63, %v1709_v62  ;;  %v1139_v60 = vpack.c.bf16 %v1678_v25, %v1677_v6  ;;  %v1705_v22 = vld [vmem:[%s3633_s0 + $0xfd0] sm:$0xff]  ;;  %v1706_v23 = vld [vmem:[%s3633_s0 + $0xfd8] sm:$0xff] }
  0xd9   :  { %1323 = vmatpush.bf16.msra.mxu1 %v1102_v37  ;;  %v3381_v35 = vpop.f32.mrf.mxu3  ;;  %v1691_v37 = vld [vmem:[%s3633_s0 + $0xf60] sm:$0xff]  ;;  %v1657_v62 = vld [vmem:[%s3633_s0 + $0xe50] sm:$0xff] }
  0xda   :  { %1341 = vmatpush.bf16.msra.mxu2 %v1110_v29  ;;  %v1092_v29 = vpack.c.bf16 %v1584_v17, %v1583_v14  ;;  %v1146_v0 = vpack.c.bf16 %v1692_v41, %v1691_v37  ;;  %v1138_v14 = vpack.c.bf16 %v1676_v59, %v1675_v52  ;;  %v1689_v17 = vld [vmem:[%s3633_s0 + $0xf50] sm:$0xff]  ;;  %v1703_v41 = vld [vmem:[%s3633_s0 + $0xfc0] sm:$0xff]  ;;  %v1702_v59 = vld [vmem:[%s3633_s0 + $0xfb8] sm:$0xff] }
  0xdb   :  { %1359 = vmatpush.bf16.msra.mxu3 %v1118_v30  ;;  %v1100_v30 = vpack.c.bf16 %v1600_v19, %v1599_v18  ;;  %v563_v42 = vpop.f32.mrf.mxu0  ;;  %v1690_v18 = vld [vmem:[%s3633_s0 + $0xf58] sm:$0xff] }
  0xdc   :  { %1306 = vmatpush.bf16.msra.mxu0 %v1093_v8  ;;  %v1154_v8 = vpack.c.bf16 %v1708_v53, %v1707_v61  ;;  %v1145_v25 = vpack.c.bf16 %v1690_v18, %v1689_v17  ;;  %v1704_v42 = vld [vmem:[%s3633_s0 + $0xfc8] sm:$0xff]  ;;  %v1671_v61 = vld [vmem:[%s3633_s0 + $0xec0] sm:$0xff]  ;;  %v1670_v17 = vld [vmem:[%s3633_s0 + $0xeb8] sm:$0xff] }
  0xdd   :  { %1324 = vmatpush.bf16.msra.mxu1 %v1101_v13  ;;  %v1672_v53 = vld [vmem:[%s3633_s0 + $0xec8] sm:$0xff] }
  0xde   :  { %1342 = vmatpush.bf16.msra.mxu2 %v1109_v2  ;;  %v581_v2 = vpop.f32.mrf.mxu1 }
  0xdf   :  { %1360 = vmatpush.bf16.msra.mxu3 %v1117_v51  ;;  %v1660_v51 = vld [vmem:[%s3633_s0 + $0xe68] sm:$0xff]  ;;  %v1686_v2 = vld [vmem:[%s3633_s0 + $0xf38] sm:$0xff] }
  0xe0   :  { %1307 = vmatpush.bf16.msra.mxu0 %v1092_v29  ;;  %v1130_v13 = vpack.c.bf16 %v1660_v51, %v1659_v49  ;;  %v599_v19 = vpop.f32.mrf.mxu2  ;;  %v1153_v29 = vpack.c.bf16 %v1706_v23, %v1705_v22  ;;  %v1685_v49 = vld [vmem:[%s3633_s0 + $0xf30] sm:$0xff] }
  0xe1   :  { %1325 = vmatpush.bf16.msra.mxu1 %v1100_v30  ;;  %v617_v63 = vpop.f32.mrf.mxu3  ;;  %v1687_v30 = vld [vmem:[%s3633_s0 + $0xf40] sm:$0xff]  ;;  %v557_v19 = vadd.f32 %v3207_v26, %v3053_v7  ;;  %v1143_v23 = vpack.c.bf16 %v1686_v2, %v1685_v49  ;;  %v1700_v26 = vld [vmem:[%s3633_s0 + $0xfa8] sm:$0xff] }
  0xe2   :  { %1343 = vmatpush.bf16.msra.mxu2 %v1108_v46  ;;  %v1673_v46 = vld [vmem:[%s3633_s0 + $0xed0] sm:$0xff]  ;;  %v1683_v63 = vld [vmem:[%s3633_s0 + $0xf20] sm:$0xff] }
  0xe3   :  { %1361 = vmatpush.bf16.msra.mxu3 %v1116_v24  ;;  %v1674_v24 = vld [vmem:[%s3633_s0 + $0xed8] sm:$0xff]  ;;  %v3431_v5 = vpop.f32.mrf.mxu0  ;;  %v1699_v7 = vld [vmem:[%s3633_s0 + $0xfa0] sm:$0xff] }
  0xe4   :  { %1372 = vmatpush.bf16.msrb.mxu0 %v1131_v43  ;;  %v1137_v37 = vpack.c.bf16 %v1674_v24, %v1673_v46  ;;  %v1655_v43 = vld [vmem:[%s3633_s0 + $0xe40] sm:$0xff]  ;;  %1326 = vmatmul.bf16.vlgmr.msra.gmra.mxu1 %v2513_v20  ;;  %v1136_v20 = vpack.c.bf16 %v1672_v53, %v1671_v61 }
  0xe5   :  { %1390 = vmatpush.bf16.msrb.mxu1 %v1139_v60  ;;  %1308 = vmatmul.bf16.vlgmr.msra.gmra.mxu0 %v2500_v15  ;;  %v1656_v60 = vld [vmem:[%s3633_s0 + $0xe48] sm:$0xff] }
  0xe6   :  { %1408 = vmatpush.bf16.msrb.mxu2 %v1147_v36  ;;  %v3433_v6 = vpop.f32.mrf.mxu1  ;;  %v1688_v36 = vld [vmem:[%s3633_s0 + $0xf48] sm:$0xff]  ;;  %1362 = vmatmul.bf16.vlgmr.msra.gmra.mxu3 %v2515_v21  ;;  %v1128_v52 = vpack.c.bf16 %v1656_v60, %v1655_v43  ;;  %v1701_v21 = vld [vmem:[%s3633_s0 + $0xfb0] sm:$0xff]  ;;  %v1682_v43 = vld [vmem:[%s3633_s0 + $0xf18] sm:$0xff] }
  0xe7   :  { %1426 = vmatpush.bf16.msrb.mxu3 %v1155_v54  ;;  %v1129_v54 = vpack.c.bf16 %v1658_v40, %v1657_v62  ;;  %1344 = vmatmul.bf16.vlgmr.msra.gmra.mxu2 %v2502_v16  ;;  %v1144_v15 = vpack.c.bf16 %v1688_v36, %v1687_v30  ;;  %v1152_v16 = vpack.c.bf16 %v1704_v42, %v1703_v41  ;;  %v1684_v40 = vld [vmem:[%s3633_s0 + $0xf28] sm:$0xff]  ;;  %v1667_v30 = vld [vmem:[%s3633_s0 + $0xea0] sm:$0xff]  ;;  %v1681_v42 = vld [vmem:[%s3633_s0 + $0xf10] sm:$0xff] }
  0xe8   :  { %1373 = vmatpush.bf16.msrb.mxu0 %v1130_v13  ;;  %v3469_v51 = vpop.f32.mrf.mxu2  ;;  %v1654_v13 = vld [vmem:[%s3633_s0 + $0xe38] sm:$0xff]  ;;  %v1151_v62 = vpack.c.bf16 %v1702_v59, %v1701_v21  ;;  %v1668_v36 = vld [vmem:[%s3633_s0 + $0xea8] sm:$0xff]  ;;  %v1150_v41 = vpack.c.bf16 %v1700_v26, %v1699_v7  ;;  %v559_v59 = vadd.f32 %v3267_v9, %v3106_v56  ;;  %v1695_v56 = vld [vmem:[%s3633_s0 + $0xf80] sm:$0xff] }
  0xe9   :  { %1391 = vmatpush.bf16.msrb.mxu1 %v1138_v14  ;;  %v1669_v14 = vld [vmem:[%s3633_s0 + $0xeb0] sm:$0xff]  ;;  %v1134_v53 = vpack.c.bf16 %v1668_v36, %v1667_v30  ;;  %v1666_v21 = vld [vmem:[%s3633_s0 + $0xe98] sm:$0xff]  ;;  %v1696_v9 = vld [vmem:[%s3633_s0 + $0xf88] sm:$0xff] }
  0xea   :  { %1409 = vmatpush.bf16.msrb.mxu2 %v1146_v0  ;;  %v1653_v0 = vld [vmem:[%s3633_s0 + $0xe30] sm:$0xff]  ;;  %v1135_v24 = vpack.c.bf16 %v1670_v17, %v1669_v14  ;;  %v1679_v17 = vld [vmem:[%s3633_s0 + $0xf00] sm:$0xff]  ;;  %v1664_v7 = vld [vmem:[%s3633_s0 + $0xe88] sm:$0xff]  ;;  %v577_v26 = vadd.f32 %v3269_v12, %v559_v59 }
  0xeb   :  { %1427 = vmatpush.bf16.msrb.mxu3 %v1154_v8  ;;  %v3480_v8 = vpop.f32.mrf.mxu3  ;;  %v3491_v18 = vpop.f32.mrf.mxu0  ;;  %v1127_v46 = vpack.c.bf16 %v1654_v13, %v1653_v0 }
  0xec   :  { %1374 = vmatpush.bf16.msrb.mxu0 %v1129_v54  ;;  %v575_v54 = vadd.f32 %v3209_v45, %v557_v19  ;;  %v1697_v45 = vld [vmem:[%s3633_s0 + $0xf90] sm:$0xff]  ;;  %v1680_v19 = vld [vmem:[%s3633_s0 + $0xf08] sm:$0xff]  ;;  %v595_v36 = vadd.f32 %v3301_v48, %v577_v26 }
  0xed   :  { %1392 = vmatpush.bf16.msrb.mxu1 %v1137_v37  ;;  %v1142_v37 = vpack.c.bf16 %v1684_v40, %v1683_v63  ;;  %v1647_v63 = vld [vmem:[%s3633_s0 + $0xe00] sm:$0xff] }
  0xee   :  { %1410 = vmatpush.bf16.msrb.mxu2 %v1145_v25  ;;  %v3495_v22 = vpop.f32.mrf.mxu1  ;;  %v1651_v25 = vld [vmem:[%s3633_s0 + $0xe20] sm:$0xff]  ;;  %v593_v49 = vadd.f32 %v3245_v47, %v575_v54  ;;  %v1141_v47 = vpack.c.bf16 %v1682_v43, %v1681_v42 }
  0xef   :  { %1428 = vmatpush.bf16.msrb.mxu3 %v1153_v29  ;;  %v1652_v29 = vld [vmem:[%s3633_s0 + $0xe28] sm:$0xff] }
  0xf0   :  { %1375 = vmatpush.bf16.msrb.mxu0 %v1128_v52  ;;  %v3528_v60 = vpop.f32.mrf.mxu2  ;;  %v1126_v61 = vpack.c.bf16 %v1652_v29, %v1651_v25  ;;  %v1650_v52 = vld [vmem:[%s3633_s0 + $0xe18] sm:$0xff]  ;;  %v611_v40 = vadd.f32 %v3256_v58, %v593_v49  ;;  %v1148_v58 = vpack.c.bf16 %v1696_v9, %v1695_v56 }
  0xf1   :  { %1393 = vmatpush.bf16.msrb.mxu1 %v1136_v20  ;;  %v1665_v20 = vld [vmem:[%s3633_s0 + $0xe90] sm:$0xff] }
  0xf2   :  { %1411 = vmatpush.bf16.msrb.mxu2 %v1144_v15  ;;  %v1698_v15 = vld [vmem:[%s3633_s0 + $0xf98] sm:$0xff] }
  0xf3   :  { %1429 = vmatpush.bf16.msrb.mxu3 %v1152_v16  ;;  %v1649_v16 = vld [vmem:[%s3633_s0 + $0xe10] sm:$0xff]  ;;  %v3540_v2 = vpop.f32.mrf.mxu3  ;;  %v633_v0 = vpop.f32.mrf.mxu0  ;;  %v1149_v14 = vpack.c.bf16 %v1698_v15, %v1697_v45 }
  0xf4   :  { %1376 = vmatpush.bf16.msrb.mxu0 %v1127_v46  ;;  %v1648_v46 = vld [vmem:[%s3633_s0 + $0xe08] sm:$0xff]  ;;  %1331 = vmatmul.bf16.gmra.mxu1 %v2633_v32  ;;  %v562_v32 = vadd.f32 %v3323_v57, %v3172_v55 }
  0xf5   :  { %1394 = vmatpush.bf16.msrb.mxu1 %v1135_v24  ;;  %1313 = vmatmul.bf16.gmra.mxu0 %v2620_v27  ;;  %v1663_v24 = vld [vmem:[%s3633_s0 + $0xe80] sm:$0xff]  ;;  %v629_v27 = vadd.f32 %v3431_v5, %v611_v40  ;;  %v1124_v29 = vpack.c.bf16 %v1648_v46, %v1647_v63  ;;  %v613_v5 = vadd.f32 %v3312_v44, %v595_v36 }
  0xf6   :  { %1412 = vmatpush.bf16.msrb.mxu2 %v1143_v23  ;;  %v3553_v13 = vpop.f32.mrf.mxu1  ;;  %v1125_v23 = vpack.c.bf16 %v1650_v52, %v1649_v16  ;;  %1367 = vmatmul.bf16.gmra.mxu3 %v2635_v33  ;;  %v1132_v30 = vpack.c.bf16 %v1664_v7, %v1663_v24  ;;  %v580_v42 = vadd.f32 %v3328_v1, %v562_v32 }
  0xf7   :  { %1430 = vmatpush.bf16.msrb.mxu3 %v1151_v62  ;;  %v1133_v62 = vpack.c.bf16 %v1666_v21, %v1665_v20  ;;  %1349 = vmatmul.bf16.gmra.mxu2 %v2622_v28  ;;  %v1140_v28 = vpack.c.bf16 %v1680_v19, %v1679_v17  ;;  %v647_v33 = vadd.f32 %v3433_v6, %v629_v27 }
  0xf8   :  { %1377 = vmatpush.bf16.msrb.mxu0 %v1126_v61  ;;  %v669_v25 = vpop.f32.mrf.mxu2  ;;  %v631_v48 = vadd.f32 %v3491_v18, %v613_v5  ;;  %v598_v61 = vadd.f32 %v3379_v50, %v580_v42 }
  0xf9   :  { %1395 = vmatpush.bf16.msrb.mxu1 %v1134_v53 }
  0xfa   :  { %1413 = vmatpush.bf16.msrb.mxu2 %v1142_v37  ;;  %v649_v53 = vadd.f32 %v3495_v22, %v631_v48  ;;  %v616_v16 = vadd.f32 %v3381_v35, %v598_v61 }
  0xfb   :  { %1431 = vmatpush.bf16.msrb.mxu3 %v1150_v41  ;;  %v687_v54 = vpop.f32.mrf.mxu3  ;;  %v635_v37 = vpop.f32.mrf.mxu0  ;;  %v665_v41 = vadd.f32 %v3469_v51, %v647_v33 }
  0xfc   :  { %1378 = vmatpush.bf16.msrb.mxu0 %v1125_v23  ;;  %v667_v44 = vadd.f32 %v3528_v60, %v649_v53  ;;  %v634_v1 = vadd.f32 %v633_v0, %v616_v16 }
  0xfd   :  { %1396 = vmatpush.bf16.msrb.mxu1 %v1133_v62  ;;  %v683_v55 = vadd.f32 %v3480_v8, %v665_v41 }
  0xfe   :  { %1414 = vmatpush.bf16.msrb.mxu2 %v1141_v47  ;;  %v653_v12 = vpop.f32.mrf.mxu1  ;;  %v685_v8 = vadd.f32 %v3540_v2, %v667_v44  ;;  %v652_v35 = vadd.f32 %v3553_v13, %v634_v1 }
  0xff   :  { %1432 = vmatpush.bf16.msrb.mxu3 %v1149_v14 }
 0x100   :  { %1379 = vmatpush.bf16.msrb.mxu0 %v1124_v29  ;;  %v671_v43 = vpop.f32.mrf.mxu2 }
 0x101   :  { %1397 = vmatpush.bf16.msrb.mxu1 %v1132_v30 }
 0x102   :  { %1415 = vmatpush.bf16.msrb.mxu2 %v1140_v28 }
 0x103   :  { %1433 = vmatpush.bf16.msrb.mxu3 %v1148_v58  ;;  %v689_v57 = vpop.f32.mrf.mxu3  ;;  %v700_v6 = vpop.f32.mrf.mxu0 }
 0x104   :  { %v701_v45 = vadd.f32 %v700_v6, %v683_v55  ;;  %1398 = vmatmul.bf16.vlgmr.msrb.gmra.mxu1 %v2777_v10 }
 0x105   :  { %1380 = vmatmul.bf16.vlgmr.msrb.gmra.mxu0 %v2764_v3  ;;  %v670_v3 = vadd.f32 %v669_v25, %v652_v35 }
 0x106   :  { %v718_v15 = vpop.f32.mrf.mxu1  ;;  %1434 = vmatmul.bf16.vlgmr.msrb.gmra.mxu3 %v2779_v11 }
 0x107   :  { %1416 = vmatmul.bf16.vlgmr.msrb.gmra.mxu2 %v2766_v4  ;;  %v719_v50 = vadd.f32 %v718_v15, %v701_v45  ;;  %v688_v21 = vadd.f32 %v687_v54, %v670_v3 }
 0x108   :  { %v736_v51 = vpop.f32.mrf.mxu2 }
 0x109   :  { %v737_v18 = vadd.f32 %v736_v51, %v719_v50 }
 0x10b   :  { %v754_v22 = vpop.f32.mrf.mxu3  ;;  %v702_v49 = vpop.f32.mrf.mxu0 }
 0x10c   :  { %v755_v52 = vadd.f32 %v754_v22, %v737_v18  ;;  %v703_v60 = vadd.f32 %v702_v49, %v685_v8 }
 0x10e   :  { %v720_v20 = vpop.f32.mrf.mxu1  ;;  %v763_v4 = vmax.f32 %v755_v52, 0.0 }
 0x10f   :  { %v721_v10 = vadd.f32 %v720_v20, %v703_v60 }
 0x110   :  { %767 = vst.msk [vmem:[%s3635_s2] sm:$0xff] %vm766_vm0, %v763_v4  ;;  %v738_v11 = vpop.f32.mrf.mxu2 }
 0x111   :  { %v739_v2 = vadd.f32 %v738_v11, %v721_v10 }
 0x113   :  { %v756_v59 = vpop.f32.mrf.mxu3  ;;  %v705_v0 = vpop.f32.mrf.mxu0 }
 0x114   :  { %v757_v47 = vadd.f32 %v756_v59, %v739_v2  ;;  %v706_v14 = vadd.f32 %v705_v0, %v688_v21  ;;  %1403 = vmatmul.bf16.gmra.mxu1 %v2897_v38 }
 0x115   :  { %1385 = vmatmul.bf16.gmra.mxu0 %v2884_v31 }
 0x116   :  { %v723_v13 = vpop.f32.mrf.mxu1  ;;  %v764_v17 = vmax.f32 %v757_v47, 0.0  ;;  %1439 = vmatmul.bf16.gmra.mxu3 %v2899_v39 }
 0x117   :  { %1421 = vmatmul.bf16.gmra.mxu2 %v2886_v34  ;;  %v724_v19 = vadd.f32 %v723_v13, %v706_v14 }
 0x118   :  { %768 = vst.msk [vmem:[%s3635_s2 + $0x8] sm:$0xff] %vm766_vm0, %v764_v17 }
 0x11a   :  { %v741_v23 = vpop.f32.mrf.mxu2 }
 0x11b   :  { %v742_v62 = vadd.f32 %v741_v23, %v724_v19  ;;  %v759_v56 = vpop.f32.mrf.mxu3  ;;  %v707_v9 = vpop.f32.mrf.mxu0 }
 0x11d   :  { %v760_v63 = vadd.f32 %v759_v56, %v742_v62 }
 0x11e   :  { %v725_v40 = vpop.f32.mrf.mxu1 }
 0x11f   :  { %v765_v31 = vmax.f32 %v760_v63, 0.0 }
 0x121   :  { %770 = vst.msk [vmem:[%s3635_s2 + $0x10] sm:$0xf] %vm769_vm1, %v765_v31 }
 0x122   :  { %v743_v34 = vpop.f32.mrf.mxu2 }
 0x123   :  { %v761_v38 = vpop.f32.mrf.mxu3  ;;  %v1165_v39 = vpop.f32.mrf.mxu0 }
 0x126   :  { %v1183_v46 = vpop.f32.mrf.mxu1 }
 0x127   :  { %v1184_v24 = vadd.f32 %v1183_v46, %v1165_v39 }
 0x12a   :  { %v1201_v7 = vpop.f32.mrf.mxu2 }
 0x12b   :  { %v1202_v26 = vadd.f32 %v1201_v7, %v1184_v24  ;;  %v1219_v27 = vpop.f32.mrf.mxu3  ;;  %v1167_v28 = vpop.f32.mrf.mxu0 }
 0x12d   :  { %v1220_v58 = vadd.f32 %v1219_v27, %v1202_v26 }
 0x12e   :  { %v1185_v25 = vpop.f32.mrf.mxu1 }
 0x12f   :  { %v1186_v29 = vadd.f32 %v1185_v25, %v1167_v28 }
 0x132   :  { %v1203_v30 = vpop.f32.mrf.mxu2 }
 0x133   :  { %v1204_v36 = vadd.f32 %v1203_v30, %v1186_v29  ;;  %v1221_v54 = vpop.f32.mrf.mxu3  ;;  %v1170_v37 = vpop.f32.mrf.mxu0 }
 0x135   :  { %v1222_v32 = vadd.f32 %v1221_v54, %v1204_v36 }
 0x136   :  { %v1188_v33 = vpop.f32.mrf.mxu1 }
 0x137   :  { %v1189_v12 = vadd.f32 %v1188_v33, %v1170_v37 }
 0x13a   :  { %v1206_v5 = vpop.f32.mrf.mxu2 }
 0x13b   :  { %v1207_v41 = vadd.f32 %v1206_v5, %v1189_v12  ;;  %v1224_v42 = vpop.f32.mrf.mxu3  ;;  %v1172_v48 = vpop.f32.mrf.mxu0 }
 0x13d   :  { %v1225_v43 = vadd.f32 %v1224_v42, %v1207_v41 }
 0x13e   :  { %v1190_v61 = vpop.f32.mrf.mxu1 }
 0x142   :  { %v1208_v55 = vpop.f32.mrf.mxu2 }
 0x143   :  { %v1226_v57 = vpop.f32.mrf.mxu3  ;;  %v1237_v6 = vpop.f32.mrf.mxu0 }
 0x144   :  { %v1238_v21 = vadd.f32 %v1237_v6, %v1220_v58 }
 0x146   :  { %v1255_v53 = vpop.f32.mrf.mxu1 }
 0x147   :  { %v1256_v59 = vadd.f32 %v1255_v53, %v1238_v21 }
 0x14a   :  { %v1273_v45 = vpop.f32.mrf.mxu2 }
 0x14b   :  { %v1291_v15 = vpop.f32.mrf.mxu3  ;;  %v1239_v16 = vpop.f32.mrf.mxu0  ;;  %v1274_v47 = vadd.f32 %v1273_v45, %v1256_v59 }
 0x14c   :  { %v1240_v17 = vadd.f32 %v1239_v16, %v1222_v32 }
 0x14d   :  { %v1292_v23 = vadd.f32 %v1291_v15, %v1274_v47 }
 0x14e   :  { %v1257_v44 = vpop.f32.mrf.mxu1 }
 0x14f   :  { %v1258_v62 = vadd.f32 %v1257_v44, %v1240_v17 }
 0x152   :  { %v1275_v1 = vpop.f32.mrf.mxu2 }
 0x153   :  { %v1293_v50 = vpop.f32.mrf.mxu3  ;;  %v1242_v51 = vpop.f32.mrf.mxu0  ;;  %v1276_v63 = vadd.f32 %v1275_v1, %v1258_v62 }
 0x154   :  { %v1243_v34 = vadd.f32 %v1242_v51, %v1225_v43 }
 0x155   :  { %v1294_v46 = vadd.f32 %v1293_v50, %v1276_v63 }
 0x156   :  { %v1260_v8 = vpop.f32.mrf.mxu1 }
 0x157   :  { %v1261_v7 = vadd.f32 %v1260_v8, %v1243_v34 }
 0x15a   :  { %v1278_v18 = vpop.f32.mrf.mxu2 }
 0x15b   :  { %v1296_v22 = vpop.f32.mrf.mxu3  ;;  %v1244_v49 = vpop.f32.mrf.mxu0  ;;  %v1279_v28 = vadd.f32 %v1278_v18, %v1261_v7 }
 0x15d   :  { %v1297_v37 = vadd.f32 %v1296_v22, %v1279_v28 }
 0x15e   :  { %v1262_v35 = vpop.f32.mrf.mxu1 }
 0x162   :  { %v1280_v52 = vpop.f32.mrf.mxu2 }
 0x163   :  { %v1298_v60 = vpop.f32.mrf.mxu3  ;;  %v1309_v20 = vpop.f32.mrf.mxu0 }
 0x164   :  { %v1310_v56 = vadd.f32 %v1309_v20, %v1292_v23 }
 0x166   :  { %v1327_v3 = vpop.f32.mrf.mxu1 }
 0x167   :  { %v1328_v38 = vadd.f32 %v1327_v3, %v1310_v56 }
 0x16a   :  { %v1345_v4 = vpop.f32.mrf.mxu2 }
 0x16b   :  { %v1363_v10 = vpop.f32.mrf.mxu3  ;;  %v1311_v11 = vpop.f32.mrf.mxu0  ;;  %v1346_v24 = vadd.f32 %v1345_v4, %v1328_v38 }
 0x16c   :  { %v1312_v26 = vadd.f32 %v1311_v11, %v1294_v46 }
 0x16d   :  { %v1364_v58 = vadd.f32 %v1363_v10, %v1346_v24 }
 0x16e   :  { %v1329_v2 = vpop.f32.mrf.mxu1 }
 0x16f   :  { %v1330_v30 = vadd.f32 %v1329_v2, %v1312_v26 }
 0x172   :  { %v1347_v0 = vpop.f32.mrf.mxu2 }
 0x173   :  { %v1365_v14 = vpop.f32.mrf.mxu3  ;;  %v1314_v13 = vpop.f32.mrf.mxu0  ;;  %v1348_v32 = vadd.f32 %v1347_v0, %v1330_v30 }
 0x174   :  { %v1315_v33 = vadd.f32 %v1314_v13, %v1297_v37 }
 0x175   :  { %v1366_v41 = vadd.f32 %v1365_v14, %v1348_v32 }
 0x176   :  { %v1332_v19 = vpop.f32.mrf.mxu1 }
 0x177   :  { %v1333_v61 = vadd.f32 %v1332_v19, %v1315_v33 }
 0x17a   :  { %v1350_v9 = vpop.f32.mrf.mxu2 }
 0x17b   :  { %v1368_v40 = vpop.f32.mrf.mxu3  ;;  %v1316_v31 = vpop.f32.mrf.mxu0  ;;  %v1351_v53 = vadd.f32 %v1350_v9, %v1333_v61 }
 0x17d   :  { %v1369_v44 = vadd.f32 %v1368_v40, %v1351_v53 }
 0x17e   :  { %v1334_v39 = vpop.f32.mrf.mxu1 }
 0x182   :  { %v1352_v27 = vpop.f32.mrf.mxu2 }
 0x183   :  { %v1370_v25 = vpop.f32.mrf.mxu3  ;;  %v1381_v29 = vpop.f32.mrf.mxu0 }
 0x184   :  { %v1382_v36 = vadd.f32 %v1381_v29, %v1364_v58 }
 0x186   :  { %v1399_v54 = vpop.f32.mrf.mxu1 }
 0x187   :  { %v1400_v12 = vadd.f32 %v1399_v54, %v1382_v36 }
 0x18a   :  { %v1417_v5 = vpop.f32.mrf.mxu2 }
 0x18b   :  { %v1418_v42 = vadd.f32 %v1417_v5, %v1400_v12  ;;  %v1435_v48 = vpop.f32.mrf.mxu3  ;;  %v1383_v43 = vpop.f32.mrf.mxu0 }
 0x18c   :  { %v1384_v57 = vadd.f32 %v1383_v43, %v1366_v41 }
 0x18d   :  { %v1436_v55 = vadd.f32 %v1435_v48, %v1418_v42 }
 0x18e   :  { %v1401_v6 = vpop.f32.mrf.mxu1 }
 0x18f   :  { %v1444_v45 = vmax.f32 %v1436_v55, 0.0  ;;  %v1402_v15 = vadd.f32 %v1401_v6, %v1384_v57 }
 0x191   :  { %1711 = vst.msk [vmem:[%s3635_s2 + $0x18] sm:$0xff] %vm766_vm0, %v1444_v45 }
 0x192   :  { %v1419_v16 = vpop.f32.mrf.mxu2 }
 0x193   :  { %v1420_v1 = vadd.f32 %v1419_v16, %v1402_v15  ;;  %v1437_v50 = vpop.f32.mrf.mxu3  ;;  %v1386_v51 = vpop.f32.mrf.mxu0 }
 0x194   :  { %v1387_v18 = vadd.f32 %v1386_v51, %v1369_v44 }
 0x195   :  { %v1438_v8 = vadd.f32 %v1437_v50, %v1420_v1 }
 0x196   :  { %v1404_v22 = vpop.f32.mrf.mxu1 }
 0x197   :  { %v1445_v49 = vmax.f32 %v1438_v8, 0.0  ;;  %v1405_v35 = vadd.f32 %v1404_v22, %v1387_v18 }
 0x199   :  { %1712 = vst.msk [vmem:[%s3635_s2 + $0x20] sm:$0xff] %vm766_vm0, %v1445_v49 }
 0x19a   :  { %v1422_v52 = vpop.f32.mrf.mxu2 }
 0x19b   :  { %v1423_v60 = vadd.f32 %v1422_v52, %v1405_v35  ;;  %v1440_v20 = vpop.f32.mrf.mxu3  ;;  %v1388_v3 = vpop.f32.mrf.mxu0 }
 0x19d   :  { %v1441_v4 = vadd.f32 %v1440_v20, %v1423_v60 }
 0x19e   :  { %v1406_v10 = vpop.f32.mrf.mxu1 }
 0x19f   :  { %v1446_v11 = vmax.f32 %v1441_v4, 0.0 }
 0x1a1   :  { %1713 = vst.msk [vmem:[%s3635_s2 + $0x28] sm:$0xf] %vm769_vm1, %v1446_v11 }
 0x1a2   :  { %v1424_v21 = vpop.f32.mrf.mxu2 }
 0x1a3   :  { %v1442_v2 = vpop.f32.mrf.mxu3 }

</bundles_post_ra>
